<compile_context>
chip_gen: v7x
topology: tpu7x:2x2x1
jax: 0.10.0
libtpu: 0.0.40
codegen_flags: <defaults>
</compile_context>

<pallas_src>
import functools
import math

import jax
import jax.numpy as jnp
from jax import lax
from jax.experimental import pallas as pl
from jax.experimental.pallas import tpu as pltpu

LRELU_SLOPE = 0.2

# Slab row layout (small-operand pack).
_ROW_BE1, _ROW_BE2, _ROW_BG1, _ROW_BG2, _ROW_BC1, _ROW_WC2, _ROW_EPS = 0, 1, 2, 3, 4, 5, 6


# ---------------------------------------------------------------------------
# Small helpers (MXU boundary casts to bf16, f32 accumulation)
# ---------------------------------------------------------------------------
def _lrelu(v):
    return jnp.where(v > 0, v, LRELU_SLOPE * v)


def _dot(a, b):
    # b is bf16; cast a only at the MXU boundary, accumulate in f32.
    return jnp.dot(a.astype(b.dtype), b, preferred_element_type=jnp.float32)


def _dot_bt(a, b):
    # a [M, K] contracted with b [N, K] over K  ==  a @ b.T, no materialized transpose.
    return lax.dot_general(a.astype(b.dtype), b,
                           dimension_numbers=(((1,), (1,)), ((), ())),
                           preferred_element_type=jnp.float32)


# ---------------------------------------------------------------------------
# The single fused kernel
# ---------------------------------------------------------------------------
def _wali_fused_kernel(x_ref, z_ref, slab_ref,
                       we1_ref, we2_ref, wg1_ref, wg2_ref,
                       wc1x_ref, wc1z_ref,
                       o_ref, lhsx_ref, lhsz_ref,
                       *, lamb, beta1, beta2):
    B, DX = x_ref.shape
    DZ = z_ref.shape[1]
    HID = we1_ref.shape[1]          # padded hidden (multiple of 128)

    x = x_ref[...]                  # [B, DX] f32
    z = z_ref[...]                  # [B, DZ] f32

    # Big weights (bf16, MXU inputs).
    we1, we2 = we1_ref[...], we2_ref[...]
    wg1, wg2 = wg1_ref[...], wg2_ref[...]
    wc1x, wc1z = wc1x_ref[...], wc1z_ref[...]

    # Small operands: static slices of the single packed slab (free).
    be1 = slab_ref[_ROW_BE1:_ROW_BE1 + 1, 0:HID]          # [1, HID]
    be2 = slab_ref[_ROW_BE2:_ROW_BE2 + 1, 0:DZ]           # [1, DZ]
    bc2 = slab_ref[_ROW_BE2:_ROW_BE2 + 1, DZ:DZ + 1]      # [1, 1]
    bg1 = slab_ref[_ROW_BG1:_ROW_BG1 + 1, 0:HID]          # [1, HID]
    bg2 = slab_ref[_ROW_BG2:_ROW_BG2 + 1, 0:DX]           # [1, DX]
    bc1 = slab_ref[_ROW_BC1:_ROW_BC1 + 1, 0:HID]          # [1, HID]
    wc2r = slab_ref[_ROW_WC2:_ROW_WC2 + 1, 0:HID]         # [1, HID] critic head row
    eps_x = slab_ref[_ROW_EPS:_ROW_EPS + B, 0:DX]         # [B, DX]  pre-broadcast eps
    eps_z = slab_ref[_ROW_EPS:_ROW_EPS + B, 0:DZ]         # [B, DZ]

    def encode(xin):        # E: x -> z
        return _dot(_lrelu(_dot(xin, we1) + be1), we2) + be2

    def generate(zin):      # G: z -> x
        return jnp.tanh(_dot(_lrelu(_dot(zin, wg1) + bg1), wg2) + bg2)

    # z_hat = E(x), x_tilde = G(z); reconstructions (detach = forward no-op).
    z_hat = encode(x)                      # [B, DZ]
    x_tilde = generate(z)                  # [B, DX]
    z_recon = encode(x_tilde)
    x_recon = generate(z_hat)

    # Interpolations for the gradient penalty ((1-eps) hoisted, eps pre-broadcast).
    ome_x = 1.0 - eps_x
    ome_z = 1.0 - eps_z
    intp_x = eps_x * x + ome_x * x_tilde   # [B, DX]
    intp_z = eps_z * z_hat + ome_z * z     # [B, DZ]

    # ---- Stacked critic layer 1: ONE pass of Wc1x / Wc1z for all 3 evaluations.
    # rows [0:B)   -> (x,       z_hat )  => data preds
    # rows [B:2B)  -> (x_tilde, z     )  => sample preds
    # rows [2B:3B) -> (intp_x,  intp_z)  => gradient penalty
    lhsx_ref[0:B, :] = x
    lhsx_ref[B:2 * B, :] = x_tilde
    lhsx_ref[2 * B:3 * B, :] = intp_x
    lhsz_ref[0:B, :] = z_hat
    lhsz_ref[B:2 * B, :] = z
    lhsz_ref[2 * B:3 * B, :] = intp_z

    pre_all = _dot(lhsx_ref[...], wc1x) + _dot(lhsz_ref[...], wc1z) + bc1   # [3B, HID]

    # Row-group masks (avoids sublane-offset slicing of the stacked result).
    row_id = lax.broadcasted_iota(jnp.int32, (3 * B, 1), 0)
    pred_sign = jnp.where(row_id < B, 1.0, jnp.where(row_id < 2 * B, -1.0, 0.0))
    intp_mask = jnp.where(row_id >= 2 * B, 1.0, 0.0)

    # Critic head (N=1): VPU multiply + lane reduce, not a 1-column MXU matmul.
    s_all = jnp.sum(_lrelu(pre_all) * wc2r, axis=1, keepdims=True) + bc2    # [3B, 1]
    eg_loss = jnp.sum(s_all * pred_sign) / B   # mean(data_preds - sample_preds)

    # Gradient penalty: analytic d(sum C(intp_x, intp_z))/d(intp) for the
    # 2-layer critic (replaces torch.autograd.grad).  Computed on all 3B rows
    # (same MXU passes) and masked to the interpolation rows.
    gh = jnp.where(pre_all > 0, 1.0, LRELU_SLOPE) * wc2r                    # [3B, HID]
    gx = _dot_bt(gh, wc1x)                                                  # [3B, DX]
    gz = _dot_bt(gh, wc1z)                                                  # [3B, DZ]
    sq = (jnp.sum(gx * gx, axis=1, keepdims=True)
          + jnp.sum(gz * gz, axis=1, keepdims=True))
    norm = jnp.sqrt(sq)
    grad_penalty = jnp.sum(((norm - 1.0) ** 2) * intp_mask) / B

    # Reconstruction losses (F.mse_loss(..., reduction='sum') / B), all f32.
    recon_x = jnp.sum((x_recon - x) ** 2) / B
    recon_z = jnp.sum((z_recon - z) ** 2) / B

    c_loss = -eg_loss + lamb * grad_penalty
    eg_loss2 = eg_loss + beta1 * recon_x + beta2 * recon_z

    o_ref[0] = c_loss
    o_ref[1] = eg_loss
    o_ref[2] = recon_x
    o_ref[3] = recon_z
    o_ref[4] = eg_loss2


# ---------------------------------------------------------------------------
# WALI.forward wrapper (single pallas_call)
# ---------------------------------------------------------------------------
def wali_forward(p, x, z, eps, lamb=10.0, beta1=0.1, beta2=0.1):
    B = x.shape[0]
    x_flat = x.reshape(B, -1).astype(jnp.float32)     # torch .view(B, -1)
    z_flat = z.reshape(B, -1).astype(jnp.float32)
    DX = x_flat.shape[1]
    DZ = z_flat.shape[1]
    HID = p["We1"].shape[1]
    HID_PAD = max(128, ((HID + 127) // 128) * 128)    # fill whole 128-lane vregs

    # --- zero-pad hidden dim to HID_PAD (mathematically exact) and cast the big
    #     MXU operands to bf16 (f32 accumulation happens in the kernel).
    def pad_n(w):  # pad output (N) dim
        return jnp.pad(w, ((0, 0), (0, HID_PAD - w.shape[1])))

    def pad_k(w):  # pad input (K) dim
        return jnp.pad(w, ((0, HID_PAD - w.shape[0]), (0, 0)))

    we1 = pad_n(p["We1"]).astype(jnp.bfloat16)        # [DX, HID_PAD]
    we2 = pad_k(p["We2"]).astype(jnp.bfloat16)        # [HID_PAD, DZ]
    wg1 = pad_n(p["Wg1"]).astype(jnp.bfloat16)        # [DZ, HID_PAD]
    wg2 = pad_k(p["Wg2"]).astype(jnp.bfloat16)        # [HID_PAD, DX]
    wc1x = pad_n(p["Wc1x"]).astype(jnp.bfloat16)      # [DX, HID_PAD]
    wc1z = pad_n(p["Wc1z"]).astype(jnp.bfloat16)      # [DZ, HID_PAD]

    # --- coalesce all small operands (biases, critic head, bc2, eps) into ONE
    #     lane-aligned f32 slab -> a single DMA instead of ~10 tiny padded ones.
    lanes = max(DX, HID_PAD, DZ + 1)
    rows = _ROW_EPS + B
    slab = jnp.zeros((rows, lanes), jnp.float32)
    slab = slab.at[_ROW_BE1, :HID].set(p["be1"].reshape(-1))
    slab = slab.at[_ROW_BE2, :DZ].set(p["be2"].reshape(-1))
    slab = slab.at[_ROW_BE2, DZ].set(p["bc2"][0, 0])
    slab = slab.at[_ROW_BG1, :HID].set(p["bg1"].reshape(-1))
    slab = slab.at[_ROW_BG2, :DX].set(p["bg2"].reshape(-1))
    slab = slab.at[_ROW_BC1, :HID].set(p["bc1"].reshape(-1))
    slab = slab.at[_ROW_WC2, :HID].set(p["Wc2"].reshape(-1))
    eps_b = jnp.broadcast_to(eps.reshape(B, 1).astype(jnp.float32), (B, lanes))
    slab = slab.at[_ROW_EPS:_ROW_EPS + B, :].set(eps_b)

    vmem = pl.BlockSpec(memory_space=pltpu.MemorySpace.VMEM)
    args = (x_flat, z_flat, slab, we1, we2, wg1, wg2, wc1x, wc1z)

    # Advisory cost estimate so XLA schedules around this tiny custom call.
    flops = int(2 * B * (2 * (DX * HID_PAD + HID_PAD * DZ)      # encode x2
                         + 2 * (DZ * HID_PAD + HID_PAD * DX)    # generate x2
                         + 3 * (DX * HID_PAD + DZ * HID_PAD)    # stacked critic L1
                         + 3 * (HID_PAD * DX + HID_PAD * DZ)))  # grad backward
    transcendentals = int(2 * B * DX)                           # two tanh passes
    bytes_accessed = int(sum(math.prod(a.shape) * a.dtype.itemsize for a in args) + 5 * 4)

    losses = pl.pallas_call(
        functools.partial(_wali_fused_kernel, lamb=lamb, beta1=beta1, beta2=beta2),
        out_shape=jax.ShapeDtypeStruct((5,), jnp.float32),
        in_specs=[vmem] * len(args),
        out_specs=pl.BlockSpec(memory_space=pltpu.MemorySpace.SMEM),
        scratch_shapes=[pltpu.VMEM((3 * B, DX), jnp.float32),   # stacked critic LHS (x side)
                        pltpu.VMEM((3 * B, DZ), jnp.float32)],  # stacked critic LHS (z side)
        cost_estimate=pl.CostEstimate(flops=flops,
                                      transcendentals=transcendentals,
                                      bytes_accessed=bytes_accessed),
    )(*args)

    return losses[0], losses[1], losses[2], losses[3], losses[4]


# ---------------------------------------------------------------------------
# Deterministic parameter init + example run
# ---------------------------------------------------------------------------
def init_params(key, dx, dz, hidden):
    ks = jax.random.split(key, 6)
    s = 0.05
    return {
        # Encoder E: x -> z
        "We1": s * jax.random.normal(ks[0], (dx, hidden), jnp.float32),
        "be1": jnp.zeros((1, hidden), jnp.float32),
        "We2": s * jax.random.normal(ks[1], (hidden, dz), jnp.float32),
        "be2": jnp.zeros((1, dz), jnp.float32),
        # Generator G: z -> x
        "Wg1": s * jax.random.normal(ks[2], (dz, hidden), jnp.float32),
        "bg1": jnp.zeros((1, hidden), jnp.float32),
        "Wg2": s * jax.random.normal(ks[3], (hidden, dx), jnp.float32),
        "bg2": jnp.zeros((1, dx), jnp.float32),
        # Critic C: [x; z] -> scalar, first layer stored split (no feature concat)
        "Wc1x": s * jax.random.normal(ks[4], (dx, hidden), jnp.float32),
        "Wc1z": s * jax.random.normal(ks[5], (dz, hidden), jnp.float32),
        "bc1": jnp.zeros((1, hidden), jnp.float32),
        "Wc2": s * jax.random.normal(jax.random.fold_in(ks[5], 1),
                                     (hidden, 1), jnp.float32),
        "bc2": jnp.zeros((1, 1), jnp.float32),
    }


if __name__ == "__main__":
    B, C, H, W = 2, 4, 16, 16
    ZDIM, HID = 32, 64
    DX = C * H * W

    key = jax.random.PRNGKey(0)
    kx, kz, keps, kp = jax.random.split(key, 4)

    x = jax.random.normal(kx, (B, C, H, W), jnp.float32)     # NCHW image
    z = jax.random.normal(kz, (B, ZDIM, 1, 1), jnp.float32)  # latent
    eps = jax.random.uniform(keps, (B, 1), jnp.float32)      # torch.rand(B,1,1,1)
    params = init_params(kp, DX, ZDIM, HID)

    fwd = jax.jit(functools.partial(wali_forward, lamb=10.0, beta1=0.1, beta2=0.1))
    out = fwd(params, x, z, eps)
    out = jax.block_until_ready(out)

    C_loss, EG_loss, RX, RZ, EG2 = [float(o) for o in out]
    # Sanity: all losses are finite scalars.
    assert all(v == v and abs(v) < 1e9 for v in (C_loss, EG_loss, RX, RZ, EG2))
    print("KERNEL_OK")
</pallas_src>

<mosaic_0001>
module attributes {stable_mosaic.version = 11 : i64} {
  func.func @_wali_fused_kernel(%arg0: memref<2x1024xf32, #tpu.memory_space<vmem>>, %arg1: memref<2x32xf32, #tpu.memory_space<vmem>>, %arg2: memref<8x1024xf32, #tpu.memory_space<vmem>>, %arg3: memref<1024x128xbf16, #tpu.memory_space<vmem>>, %arg4: memref<128x32xbf16, #tpu.memory_space<vmem>>, %arg5: memref<32x128xbf16, #tpu.memory_space<vmem>>, %arg6: memref<128x1024xbf16, #tpu.memory_space<vmem>>, %arg7: memref<1024x128xbf16, #tpu.memory_space<vmem>>, %arg8: memref<32x128xbf16, #tpu.memory_space<vmem>>, %arg9: memref<5xf32, #tpu.memory_space<smem>>, %arg10: memref<6x1024xf32, #tpu.memory_space<vmem>>, %arg11: memref<6x32xf32, #tpu.memory_space<vmem>>) attributes {dimension_semantics = [], scalar_prefetch = 0 : i64, scratch_operands = 2 : i64, tpu.core_type = #tpu.core_type<tc>} {
    %c0 = arith.constant 0 : index
    %c0_0 = arith.constant 0 : index
    %0 = vector.load %arg0[%c0, %c0_0] : memref<2x1024xf32, #tpu.memory_space<vmem>>, vector<2x1024xf32>
    %c0_1 = arith.constant 0 : index
    %c0_2 = arith.constant 0 : index
    %1 = vector.load %arg1[%c0_1, %c0_2] : memref<2x32xf32, #tpu.memory_space<vmem>>, vector<2x32xf32>
    %c0_3 = arith.constant 0 : index
    %c0_4 = arith.constant 0 : index
    %2 = vector.load %arg3[%c0_3, %c0_4] : memref<1024x128xbf16, #tpu.memory_space<vmem>>, vector<1024x128xbf16>
    %c0_5 = arith.constant 0 : index
    %c0_6 = arith.constant 0 : index
    %3 = vector.load %arg4[%c0_5, %c0_6] : memref<128x32xbf16, #tpu.memory_space<vmem>>, vector<128x32xbf16>
    %c0_7 = arith.constant 0 : index
    %c0_8 = arith.constant 0 : index
    %4 = vector.load %arg5[%c0_7, %c0_8] : memref<32x128xbf16, #tpu.memory_space<vmem>>, vector<32x128xbf16>
    %c0_9 = arith.constant 0 : index
    %c0_10 = arith.constant 0 : index
    %5 = vector.load %arg6[%c0_9, %c0_10] : memref<128x1024xbf16, #tpu.memory_space<vmem>>, vector<128x1024xbf16>
    %c0_11 = arith.constant 0 : index
    %c0_12 = arith.constant 0 : index
    %6 = vector.load %arg7[%c0_11, %c0_12] : memref<1024x128xbf16, #tpu.memory_space<vmem>>, vector<1024x128xbf16>
    %c0_13 = arith.constant 0 : index
    %c0_14 = arith.constant 0 : index
    %7 = vector.load %arg8[%c0_13, %c0_14] : memref<32x128xbf16, #tpu.memory_space<vmem>>, vector<32x128xbf16>
    %c0_15 = arith.constant 0 : index
    %c0_16 = arith.constant 0 : index
    %8 = vector.load %arg2[%c0_15, %c0_16] : memref<8x1024xf32, #tpu.memory_space<vmem>>, vector<1x128xf32>
    %c1 = arith.constant 1 : index
    %c0_17 = arith.constant 0 : index
    %9 = vector.load %arg2[%c1, %c0_17] : memref<8x1024xf32, #tpu.memory_space<vmem>>, vector<1x32xf32>
    %c1_18 = arith.constant 1 : index
    %c32 = arith.constant 32 : index
    %10 = vector.load %arg2[%c1_18, %c32] : memref<8x1024xf32, #tpu.memory_space<vmem>>, vector<1x1xf32>
    %c2 = arith.constant 2 : index
    %c0_19 = arith.constant 0 : index
    %11 = vector.load %arg2[%c2, %c0_19] : memref<8x1024xf32, #tpu.memory_space<vmem>>, vector<1x128xf32>
    %c3 = arith.constant 3 : index
    %c0_20 = arith.constant 0 : index
    %12 = vector.load %arg2[%c3, %c0_20] : memref<8x1024xf32, #tpu.memory_space<vmem>>, vector<1x1024xf32>
    %c4 = arith.constant 4 : index
    %c0_21 = arith.constant 0 : index
    %13 = vector.load %arg2[%c4, %c0_21] : memref<8x1024xf32, #tpu.memory_space<vmem>>, vector<1x128xf32>
    %c5 = arith.constant 5 : index
    %c0_22 = arith.constant 0 : index
    %14 = vector.load %arg2[%c5, %c0_22] : memref<8x1024xf32, #tpu.memory_space<vmem>>, vector<1x128xf32>
    %c6 = arith.constant 6 : index
    %c0_23 = arith.constant 0 : index
    %15 = vector.load %arg2[%c6, %c0_23] : memref<8x1024xf32, #tpu.memory_space<vmem>>, vector<2x1024xf32>
    %c6_24 = arith.constant 6 : index
    %c0_25 = arith.constant 0 : index
    %16 = vector.load %arg2[%c6_24, %c0_25] : memref<8x1024xf32, #tpu.memory_space<vmem>>, vector<2x32xf32>
    %17 = arith.truncf %0 : vector<2x1024xf32> to vector<2x1024xbf16>
    %cst = arith.constant dense<0.000000e+00> : vector<2x128xf32>
    %18 = tpu.matmul %17, %2, %cst {dimension_numbers = #tpu.dot_dimension_numbers<[1], [0], [0], [1], [0, 0, 1, 1], [], []>} : vector<2x1024xbf16>, vector<1024x128xbf16>, vector<2x128xf32> -> vector<2x128xf32>
    %19 = vector.broadcast %8 : vector<1x128xf32> to vector<2x128xf32>
    %20 = arith.addf %18, %19 : vector<2x128xf32>
    %cst_26 = arith.constant 0.000000e+00 : f32
    %21 = vector.broadcast %cst_26 : f32 to vector<2x128xf32>
    %22 = arith.cmpf ogt, %20, %21 : vector<2x128xf32>
    %cst_27 = arith.constant 2.000000e-01 : f32
    %23 = vector.broadcast %cst_27 : f32 to vector<2x128xf32>
    %24 = arith.mulf %23, %20 : vector<2x128xf32>
    %25 = arith.select %22, %20, %24 : vector<2x128xi1>, vector<2x128xf32>
    %26 = arith.truncf %25 : vector<2x128xf32> to vector<2x128xbf16>
    %cst_28 = arith.constant dense<0.000000e+00> : vector<2x32xf32>
    %27 = tpu.matmul %26, %3, %cst_28 {dimension_numbers = #tpu.dot_dimension_numbers<[1], [0], [0], [1], [0, 0, 1, 1], [], []>} : vector<2x128xbf16>, vector<128x32xbf16>, vector<2x32xf32> -> vector<2x32xf32>
    %28 = vector.broadcast %9 : vector<1x32xf32> to vector<2x32xf32>
    %29 = arith.addf %27, %28 : vector<2x32xf32>
    %30 = arith.truncf %1 : vector<2x32xf32> to vector<2x32xbf16>
    %cst_29 = arith.constant dense<0.000000e+00> : vector<2x128xf32>
    %31 = tpu.matmul %30, %4, %cst_29 {dimension_numbers = #tpu.dot_dimension_numbers<[1], [0], [0], [1], [0, 0, 1, 1], [], []>} : vector<2x32xbf16>, vector<32x128xbf16>, vector<2x128xf32> -> vector<2x128xf32>
    %32 = vector.broadcast %11 : vector<1x128xf32> to vector<2x128xf32>
    %33 = arith.addf %31, %32 : vector<2x128xf32>
    %cst_30 = arith.constant 0.000000e+00 : f32
    %34 = vector.broadcast %cst_30 : f32 to vector<2x128xf32>
    %35 = arith.cmpf ogt, %33, %34 : vector<2x128xf32>
    %cst_31 = arith.constant 2.000000e-01 : f32
    %36 = vector.broadcast %cst_31 : f32 to vector<2x128xf32>
    %37 = arith.mulf %36, %33 : vector<2x128xf32>
    %38 = arith.select %35, %33, %37 : vector<2x128xi1>, vector<2x128xf32>
    %39 = arith.truncf %38 : vector<2x128xf32> to vector<2x128xbf16>
    %cst_32 = arith.constant dense<0.000000e+00> : vector<2x1024xf32>
    %40 = tpu.matmul %39, %5, %cst_32 {dimension_numbers = #tpu.dot_dimension_numbers<[1], [0], [0], [1], [0, 0, 1, 1], [], []>} : vector<2x128xbf16>, vector<128x1024xbf16>, vector<2x1024xf32> -> vector<2x1024xf32>
    %41 = vector.broadcast %12 : vector<1x1024xf32> to vector<2x1024xf32>
    %42 = arith.addf %40, %41 : vector<2x1024xf32>
    %43 = math.tanh %42 : vector<2x1024xf32>
    %44 = arith.truncf %43 : vector<2x1024xf32> to vector<2x1024xbf16>
    %cst_33 = arith.constant dense<0.000000e+00> : vector<2x128xf32>
    %45 = tpu.matmul %44, %2, %cst_33 {dimension_numbers = #tpu.dot_dimension_numbers<[1], [0], [0], [1], [0, 0, 1, 1], [], []>} : vector<2x1024xbf16>, vector<1024x128xbf16>, vector<2x128xf32> -> vector<2x128xf32>
    %46 = vector.broadcast %8 : vector<1x128xf32> to vector<2x128xf32>
    %47 = arith.addf %45, %46 : vector<2x128xf32>
    %cst_34 = arith.constant 0.000000e+00 : f32
    %48 = vector.broadcast %cst_34 : f32 to vector<2x128xf32>
    %49 = arith.cmpf ogt, %47, %48 : vector<2x128xf32>
    %cst_35 = arith.constant 2.000000e-01 : f32
    %50 = vector.broadcast %cst_35 : f32 to vector<2x128xf32>
    %51 = arith.mulf %50, %47 : vector<2x128xf32>
    %52 = arith.select %49, %47, %51 : vector<2x128xi1>, vector<2x128xf32>
    %53 = arith.truncf %52 : vector<2x128xf32> to vector<2x128xbf16>
    %cst_36 = arith.constant dense<0.000000e+00> : vector<2x32xf32>
    %54 = tpu.matmul %53, %3, %cst_36 {dimension_numbers = #tpu.dot_dimension_numbers<[1], [0], [0], [1], [0, 0, 1, 1], [], []>} : vector<2x128xbf16>, vector<128x32xbf16>, vector<2x32xf32> -> vector<2x32xf32>
    %55 = vector.broadcast %9 : vector<1x32xf32> to vector<2x32xf32>
    %56 = arith.addf %54, %55 : vector<2x32xf32>
    %57 = arith.truncf %29 : vector<2x32xf32> to vector<2x32xbf16>
    %cst_37 = arith.constant dense<0.000000e+00> : vector<2x128xf32>
    %58 = tpu.matmul %57, %4, %cst_37 {dimension_numbers = #tpu.dot_dimension_numbers<[1], [0], [0], [1], [0, 0, 1, 1], [], []>} : vector<2x32xbf16>, vector<32x128xbf16>, vector<2x128xf32> -> vector<2x128xf32>
    %59 = vector.broadcast %11 : vector<1x128xf32> to vector<2x128xf32>
    %60 = arith.addf %58, %59 : vector<2x128xf32>
    %cst_38 = arith.constant 0.000000e+00 : f32
    %61 = vector.broadcast %cst_38 : f32 to vector<2x128xf32>
    %62 = arith.cmpf ogt, %60, %61 : vector<2x128xf32>
    %cst_39 = arith.constant 2.000000e-01 : f32
    %63 = vector.broadcast %cst_39 : f32 to vector<2x128xf32>
    %64 = arith.mulf %63, %60 : vector<2x128xf32>
    %65 = arith.select %62, %60, %64 : vector<2x128xi1>, vector<2x128xf32>
    %66 = arith.truncf %65 : vector<2x128xf32> to vector<2x128xbf16>
    %cst_40 = arith.constant dense<0.000000e+00> : vector<2x1024xf32>
    %67 = tpu.matmul %66, %5, %cst_40 {dimension_numbers = #tpu.dot_dimension_numbers<[1], [0], [0], [1], [0, 0, 1, 1], [], []>} : vector<2x128xbf16>, vector<128x1024xbf16>, vector<2x1024xf32> -> vector<2x1024xf32>
    %68 = vector.broadcast %12 : vector<1x1024xf32> to vector<2x1024xf32>
    %69 = arith.addf %67, %68 : vector<2x1024xf32>
    %70 = math.tanh %69 : vector<2x1024xf32>
    %cst_41 = arith.constant 1.000000e+00 : f32
    %71 = vector.broadcast %cst_41 : f32 to vector<2x1024xf32>
    %72 = arith.subf %71, %15 : vector<2x1024xf32>
    %cst_42 = arith.constant 1.000000e+00 : f32
    %73 = vector.broadcast %cst_42 : f32 to vector<2x32xf32>
    %74 = arith.subf %73, %16 : vector<2x32xf32>
    %75 = arith.mulf %15, %0 : vector<2x1024xf32>
    %76 = arith.mulf %72, %43 : vector<2x1024xf32>
    %77 = arith.addf %75, %76 : vector<2x1024xf32>
    %78 = arith.mulf %16, %29 : vector<2x32xf32>
    %79 = arith.mulf %74, %1 : vector<2x32xf32>
    %80 = arith.addf %78, %79 : vector<2x32xf32>
    %c0_43 = arith.constant 0 : index
    %c0_44 = arith.constant 0 : index
    %81 = vector.load %arg10[%c0_43, %c0_44] : memref<6x1024xf32, #tpu.memory_space<vmem>>, vector<2x1024xf32>
    tpu.vector_store %arg10[%c0_43, %c0_44], %0 {strides = array<i32>} : memref<6x1024xf32, #tpu.memory_space<vmem>>, vector<2x1024xf32>,
    %c2_45 = arith.constant 2 : index
    %c0_46 = arith.constant 0 : index
    %82 = vector.load %arg10[%c2_45, %c0_46] : memref<6x1024xf32, #tpu.memory_space<vmem>>, vector<2x1024xf32>
    tpu.vector_store %arg10[%c2_45, %c0_46], %43 {strides = array<i32>} : memref<6x1024xf32, #tpu.memory_space<vmem>>, vector<2x1024xf32>,
    %c4_47 = arith.constant 4 : index
    %c0_48 = arith.constant 0 : index
    %83 = vector.load %arg10[%c4_47, %c0_48] : memref<6x1024xf32, #tpu.memory_space<vmem>>, vector<2x1024xf32>
    tpu.vector_store %arg10[%c4_47, %c0_48], %77 {strides = array<i32>} : memref<6x1024xf32, #tpu.memory_space<vmem>>, vector<2x1024xf32>,
    %c0_49 = arith.constant 0 : index
    %c0_50 = arith.constant 0 : index
    %84 = vector.load %arg11[%c0_49, %c0_50] : memref<6x32xf32, #tpu.memory_space<vmem>>, vector<2x32xf32>
    tpu.vector_store %arg11[%c0_49, %c0_50], %29 {strides = array<i32>} : memref<6x32xf32, #tpu.memory_space<vmem>>, vector<2x32xf32>,
    %c2_51 = arith.constant 2 : index
    %c0_52 = arith.constant 0 : index
    %85 = vector.load %arg11[%c2_51, %c0_52] : memref<6x32xf32, #tpu.memory_space<vmem>>, vector<2x32xf32>
    tpu.vector_store %arg11[%c2_51, %c0_52], %1 {strides = array<i32>} : memref<6x32xf32, #tpu.memory_space<vmem>>, vector<2x32xf32>,
    %c4_53 = arith.constant 4 : index
    %c0_54 = arith.constant 0 : index
    %86 = vector.load %arg11[%c4_53, %c0_54] : memref<6x32xf32, #tpu.memory_space<vmem>>, vector<2x32xf32>
    tpu.vector_store %arg11[%c4_53, %c0_54], %80 {strides = array<i32>} : memref<6x32xf32, #tpu.memory_space<vmem>>, vector<2x32xf32>,
    %c0_55 = arith.constant 0 : index
    %c0_56 = arith.constant 0 : index
    %87 = vector.load %arg10[%c0_55, %c0_56] : memref<6x1024xf32, #tpu.memory_space<vmem>>, vector<6x1024xf32>
    %88 = arith.truncf %87 : vector<6x1024xf32> to vector<6x1024xbf16>
    %cst_57 = arith.constant dense<0.000000e+00> : vector<6x128xf32>
    %89 = tpu.matmul %88, %6, %cst_57 {dimension_numbers = #tpu.dot_dimension_numbers<[1], [0], [0], [1], [0, 0, 1, 1], [], []>} : vector<6x1024xbf16>, vector<1024x128xbf16>, vector<6x128xf32> -> vector<6x128xf32>
    %c0_58 = arith.constant 0 : index
    %c0_59 = arith.constant 0 : index
    %90 = vector.load %arg11[%c0_58, %c0_59] : memref<6x32xf32, #tpu.memory_space<vmem>>, vector<6x32xf32>
    %91 = arith.truncf %90 : vector<6x32xf32> to vector<6x32xbf16>
    %cst_60 = arith.constant dense<0.000000e+00> : vector<6x128xf32>
    %92 = tpu.matmul %91, %7, %cst_60 {dimension_numbers = #tpu.dot_dimension_numbers<[1], [0], [0], [1], [0, 0, 1, 1], [], []>} : vector<6x32xbf16>, vector<32x128xbf16>, vector<6x128xf32> -> vector<6x128xf32>
    %93 = arith.addf %89, %92 : vector<6x128xf32>
    %94 = vector.broadcast %13 : vector<1x128xf32> to vector<6x128xf32>
    %95 = arith.addf %93, %94 : vector<6x128xf32>
    %96 = tpu.iota {dimensions = array<i32: 0>} : vector<6x1xi32>
    %c2_i32 = arith.constant 2 : i32
    %97 = vector.broadcast %c2_i32 : i32 to vector<6x1xi32>
    %98 = arith.cmpi slt, %96, %97 : vector<6x1xi32>
    %c4_i32 = arith.constant 4 : i32
    %99 = vector.broadcast %c4_i32 : i32 to vector<6x1xi32>
    %100 = arith.cmpi slt, %96, %99 : vector<6x1xi32>
    %cst_61 = arith.constant -1.000000e+00 : f32
    %cst_62 = arith.constant 0.000000e+00 : f32
    %101 = vector.broadcast %cst_61 : f32 to vector<6x1xf32>
    %102 = vector.broadcast %cst_62 : f32 to vector<6x1xf32>
    %103 = arith.select %100, %101, %102 : vector<6x1xi1>, vector<6x1xf32>
    %cst_63 = arith.constant 1.000000e+00 : f32
    %104 = vector.broadcast %cst_63 : f32 to vector<6x1xf32>
    %105 = arith.select %98, %104, %103 : vector<6x1xi1>, vector<6x1xf32>
    %c4_i32_64 = arith.constant 4 : i32
    %106 = vector.broadcast %c4_i32_64 : i32 to vector<6x1xi32>
    %107 = arith.cmpi sge, %96, %106 : vector<6x1xi32>
    %cst_65 = arith.constant 1.000000e+00 : f32
    %cst_66 = arith.constant 0.000000e+00 : f32
    %108 = vector.broadcast %cst_65 : f32 to vector<6x1xf32>
    %109 = vector.broadcast %cst_66 : f32 to vector<6x1xf32>
    %110 = arith.select %107, %108, %109 : vector<6x1xi1>, vector<6x1xf32>
    %cst_67 = arith.constant 0.000000e+00 : f32
    %111 = vector.broadcast %cst_67 : f32 to vector<6x128xf32>
    %112 = arith.cmpf ogt, %95, %111 : vector<6x128xf32>
    %cst_68 = arith.constant 2.000000e-01 : f32
    %113 = vector.broadcast %cst_68 : f32 to vector<6x128xf32>
    %114 = arith.mulf %113, %95 : vector<6x128xf32>
    %115 = arith.select %112, %95, %114 : vector<6x128xi1>, vector<6x128xf32>
    %116 = vector.broadcast %14 : vector<1x128xf32> to vector<6x128xf32>
    %117 = arith.mulf %115, %116 : vector<6x128xf32>
    %cst_69 = arith.constant dense<0.000000e+00> : vector<6xf32>
    %118 = vector.multi_reduction <add>, %117, %cst_69 [1] : vector<6x128xf32> to vector<6xf32>
    %119 = vector.shape_cast %118 : vector<6xf32> to vector<6x1xf32>
    %120 = vector.broadcast %10 : vector<1x1xf32> to vector<6x1xf32>
    %121 = arith.addf %119, %120 : vector<6x1xf32>
    %122 = arith.mulf %121, %105 : vector<6x1xf32>
    %123 = vector.shape_cast %122 : vector<6x1xf32> to vector<1x6x1xf32>
    %cst_70 = arith.constant dense<0.000000e+00> : vector<1xf32>
    %124 = vector.multi_reduction <add>, %123, %cst_70 [1, 2] : vector<1x6x1xf32> to vector<1xf32>
    %125 = vector.shape_cast %124 : vector<1xf32> to vector<1x1x1xf32>
    %126 = vector.extract %125[0, 0, 0] : f32 from vector<1x1x1xf32>
    %cst_71 = arith.constant 2.000000e+00 : f32
    %127 = arith.divf %126, %cst_71 : f32
    %cst_72 = arith.constant 0.000000e+00 : f32
    %128 = vector.broadcast %cst_72 : f32 to vector<6x128xf32>
    %129 = arith.cmpf ogt, %95, %128 : vector<6x128xf32>
    %cst_73 = arith.constant 1.000000e+00 : f32
    %cst_74 = arith.constant 2.000000e-01 : f32
    %130 = vector.broadcast %cst_73 : f32 to vector<6x128xf32>
    %131 = vector.broadcast %cst_74 : f32 to vector<6x128xf32>
    %132 = arith.select %129, %130, %131 : vector<6x128xi1>, vector<6x128xf32>
    %133 = vector.broadcast %14 : vector<1x128xf32> to vector<6x128xf32>
    %134 = arith.mulf %132, %133 : vector<6x128xf32>
    %135 = arith.truncf %134 : vector<6x128xf32> to vector<6x128xbf16>
    %cst_75 = arith.constant dense<0.000000e+00> : vector<6x1024xf32>
    %136 = tpu.matmul %135, %6, %cst_75 {dimension_numbers = #tpu.dot_dimension_numbers<[1], [1], [0], [0], [0, 0, 1, 0], [], []>} : vector<6x128xbf16>, vector<1024x128xbf16>, vector<6x1024xf32> -> vector<6x1024xf32>
    %137 = arith.truncf %134 : vector<6x128xf32> to vector<6x128xbf16>
    %cst_76 = arith.constant dense<0.000000e+00> : vector<6x32xf32>
    %138 = tpu.matmul %137, %7, %cst_76 {dimension_numbers = #tpu.dot_dimension_numbers<[1], [1], [0], [0], [0, 0, 1, 0], [], []>} : vector<6x128xbf16>, vector<32x128xbf16>, vector<6x32xf32> -> vector<6x32xf32>
    %139 = arith.mulf %136, %136 : vector<6x1024xf32>
    %cst_77 = arith.constant dense<0.000000e+00> : vector<6xf32>
    %140 = vector.multi_reduction <add>, %139, %cst_77 [1] : vector<6x1024xf32> to vector<6xf32>
    %141 = vector.shape_cast %140 : vector<6xf32> to vector<6x1xf32>
    %142 = arith.mulf %138, %138 : vector<6x32xf32>
    %cst_78 = arith.constant dense<0.000000e+00> : vector<6xf32>
    %143 = vector.multi_reduction <add>, %142, %cst_78 [1] : vector<6x32xf32> to vector<6xf32>
    %144 = vector.shape_cast %143 : vector<6xf32> to vector<6x1xf32>
    %145 = arith.addf %141, %144 : vector<6x1xf32>
    %146 = math.sqrt %145 : vector<6x1xf32>
    %cst_79 = arith.constant 1.000000e+00 : f32
    %147 = vector.broadcast %cst_79 : f32 to vector<6x1xf32>
    %148 = arith.subf %146, %147 : vector<6x1xf32>
    %149 = arith.mulf %148, %148 : vector<6x1xf32>
    %150 = arith.mulf %149, %110 : vector<6x1xf32>
    %151 = vector.shape_cast %150 : vector<6x1xf32> to vector<1x6x1xf32>
    %cst_80 = arith.constant dense<0.000000e+00> : vector<1xf32>
    %152 = vector.multi_reduction <add>, %151, %cst_80 [1, 2] : vector<1x6x1xf32> to vector<1xf32>
    %153 = vector.shape_cast %152 : vector<1xf32> to vector<1x1x1xf32>
    %154 = vector.extract %153[0, 0, 0] : f32 from vector<1x1x1xf32>
    %cst_81 = arith.constant 2.000000e+00 : f32
    %155 = arith.divf %154, %cst_81 : f32
    %156 = arith.subf %70, %0 : vector<2x1024xf32>
    %157 = arith.mulf %156, %156 : vector<2x1024xf32>
    %158 = vector.shape_cast %157 : vector<2x1024xf32> to vector<1x2x1024xf32>
    %cst_82 = arith.constant dense<0.000000e+00> : vector<1xf32>
    %159 = vector.multi_reduction <add>, %158, %cst_82 [1, 2] : vector<1x2x1024xf32> to vector<1xf32>
    %160 = vector.shape_cast %159 : vector<1xf32> to vector<1x1x1xf32>
    %161 = vector.extract %160[0, 0, 0] : f32 from vector<1x1x1xf32>
    %cst_83 = arith.constant 2.000000e+00 : f32
    %162 = arith.divf %161, %cst_83 : f32
    %163 = arith.subf %56, %1 : vector<2x32xf32>
    %164 = arith.mulf %163, %163 : vector<2x32xf32>
    %165 = vector.shape_cast %164 : vector<2x32xf32> to vector<1x2x32xf32>
    %cst_84 = arith.constant dense<0.000000e+00> : vector<1xf32>
    %166 = vector.multi_reduction <add>, %165, %cst_84 [1, 2] : vector<1x2x32xf32> to vector<1xf32>
    %167 = vector.shape_cast %166 : vector<1xf32> to vector<1x1x1xf32>
    %168 = vector.extract %167[0, 0, 0] : f32 from vector<1x1x1xf32>
    %cst_85 = arith.constant 2.000000e+00 : f32
    %169 = arith.divf %168, %cst_85 : f32
    %cst_86 = arith.constant 0.000000e+00 : f32
    %170 = arith.subf %cst_86, %127 : f32
    %cst_87 = arith.constant 1.000000e+01 : f32
    %171 = arith.mulf %cst_87, %155 : f32
    %172 = arith.addf %170, %171 : f32
    %cst_88 = arith.constant 1.000000e-01 : f32
    %173 = arith.mulf %cst_88, %162 : f32
    %174 = arith.addf %127, %173 : f32
    %cst_89 = arith.constant 1.000000e-01 : f32
    %175 = arith.mulf %cst_89, %169 : f32
    %176 = arith.addf %174, %175 : f32
    %c0_90 = arith.constant 0 : index
    %177 = memref.load %arg9[%c0_90] : memref<5xf32, #tpu.memory_space<smem>>
    memref.store %172, %arg9[%c0_90] : memref<5xf32, #tpu.memory_space<smem>>
    %c1_91 = arith.constant 1 : index
    %178 = memref.load %arg9[%c1_91] : memref<5xf32, #tpu.memory_space<smem>>
    memref.store %127, %arg9[%c1_91] : memref<5xf32, #tpu.memory_space<smem>>
    %c2_92 = arith.constant 2 : index
    %179 = memref.load %arg9[%c2_92] : memref<5xf32, #tpu.memory_space<smem>>
    memref.store %162, %arg9[%c2_92] : memref<5xf32, #tpu.memory_space<smem>>
    %c3_93 = arith.constant 3 : index
    %180 = memref.load %arg9[%c3_93] : memref<5xf32, #tpu.memory_space<smem>>
    memref.store %169, %arg9[%c3_93] : memref<5xf32, #tpu.memory_space<smem>>
    %c4_94 = arith.constant 4 : index
    %181 = memref.load %arg9[%c4_94] : memref<5xf32, #tpu.memory_space<smem>>
    memref.store %176, %arg9[%c4_94] : memref<5xf32, #tpu.memory_space<smem>>
    return
  }
}

</mosaic_0001>

<bundles_post_ra>
// kernel: wali_forward.1
= control target key start
LH: loop header
LB: loop body
LE: loop exit
PB: predicated region body
PF: predicated region fallthrough
CT: control target
= control target key end

     0   :  { %v405_v31 = vlaneseq  ;;  %v4204_v35 = vmov 1983009808   ;;  %vm1100_vm0 = vcmask 261120   ;;  %vm4206_vm1 = vmmov 0   ;;  %s5928_s0 = inlined_call_operand.vmem [shape: f32[2,1024], index: 0, kind: input, shape index: {}]   ;;  %s5929_s1 = inlined_call_operand.vmem [shape: f32[2,32], index: 1, kind: input, shape index: {}]   ;;  %s5930_s2 = inlined_call_operand.vmem [shape: f32[8,1024], index: 2, kind: input, shape index: {}]   ;;  %s5931_s3 = inlined_call_operand.vmem [shape: bf16[1024,128], index: 3, kind: input, shape index: {}]   ;;  %s5932_s4 = inlined_call_operand.vmem [shape: bf16[128,32], index: 4, kind: input, shape index: {}]   ;;  %s5933_s5 = inlined_call_operand.vmem [shape: bf16[32,128], index: 5, kind: input, shape index: {}]   ;;  %s5934_s6 = inlined_call_operand.vmem [shape: bf16[128,1024], index: 6, kind: input, shape index: {}]   ;;  %s5935_s7 = inlined_call_operand.vmem [shape: bf16[1024,128], index: 7, kind: input, shape index: {}]   ;;  %s5936_s8 = inlined_call_operand.vmem [shape: bf16[32,128], index: 8, kind: input, shape index: {}]   ;;  %s5937_s9 = inlined_call_operand.vmem [shape: f32[5], index: 9, kind: output, shape index: {}]  }
   0x1   :  { %v3947_v0 = vld [vmem:[%s5931_s3 + $0x40] sm:$0xff]   ;;  %v3951_v4 = vld [vmem:[%s5931_s3 + $0x48] sm:$0xff]   ;;  %v3955_v8 = vld [vmem:[%s5931_s3 + $0x50] sm:$0xff]   ;;  %v403_v36 = vunpack.c.l.s4 %v4204_v35 }
   0x2   :  { %v3948_v1 = vld [vmem:[%s5931_s3 + $0xc0] sm:$0xff]   ;;  %3494 = vmatprep.subr.bf16.mxu0 %v3947_v0  ;;  %v3952_v5 = vld [vmem:[%s5931_s3 + $0xc8] sm:$0xff]   ;;  %v3956_v9 = vld [vmem:[%s5931_s3 + $0xd0] sm:$0xff]   ;;  %v4360_v37 = vshrl.u32 %v405_v31, 7  ;;  %v5938_v31 = vmov 0.0  }
   0x3   :  { %v3949_v2 = vld [vmem:[%s5931_s3] sm:$0xff]   ;;  %3516 = vmatprep.subr.bf16.mxu1 %v3948_v1  ;;  %v3953_v6 = vld [vmem:[%s5931_s3 + $0x8] sm:$0xff]   ;;  %v3957_v10 = vld [vmem:[%s5931_s3 + $0x10] sm:$0xff]   ;;  %v404_v40 = vunpack.c.0.s8 %v403_v36 }
   0x4   :  { %v3950_v3 = vld [vmem:[%s5931_s3 + $0x80] sm:$0xff]   ;;  %3495 = vmatpush3.bf16.msra.mxu0 %v3949_v2  ;;  %v3954_v7 = vld [vmem:[%s5931_s3 + $0x88] sm:$0xff]   ;;  %v3958_v11 = vld [vmem:[%s5931_s3 + $0x90] sm:$0xff]   ;;  %6005 = vst [vmem:[#allocation7_spill] sm:$0xff] %v4360_v37 }
   0x5   :  { %3517 = vmatpush3.bf16.msra.mxu1 %v3950_v3  ;;  %3496 = vmatprep.subr.bf16.mxu0 %v3951_v4  ;;  %v3959_v12 = vld [vmem:[%s5931_s3 + $0x58] sm:$0xff]   ;;  %v3963_v16 = vld [vmem:[%s5931_s3 + $0x60] sm:$0xff]   ;;  %v3967_v20 = vld [vmem:[%s5931_s3 + $0x68] sm:$0xff]   ;;  %v4369_v42 = vsub.s32 %v404_v40, %v4360_v37 }
   0x6   :  { %3518 = vmatprep.subr.bf16.mxu1 %v3952_v5  ;;  %v3960_v13 = vld [vmem:[%s5931_s3 + $0xd8] sm:$0xff]   ;;  %v3964_v17 = vld [vmem:[%s5931_s3 + $0xe0] sm:$0xff]   ;;  %v3968_v21 = vld [vmem:[%s5931_s3 + $0xe8] sm:$0xff]  }
   0x7   :  { %v3961_v14 = vld [vmem:[%s5931_s3 + $0x18] sm:$0xff]   ;;  %v3965_v18 = vld [vmem:[%s5931_s3 + $0x20] sm:$0xff]   ;;  %v3969_v22 = vld [vmem:[%s5931_s3 + $0x28] sm:$0xff]  }
   0x8   :  { %3497 = vmatpush3.bf16.msra.mxu0 %v3953_v6  ;;  %v3962_v15 = vld [vmem:[%s5931_s3 + $0x98] sm:$0xff]   ;;  %v3966_v19 = vld [vmem:[%s5931_s3 + $0xa0] sm:$0xff]   ;;  %v3970_v23 = vld [vmem:[%s5931_s3 + $0xa8] sm:$0xff]  }
   0x9   :  { %3519 = vmatpush3.bf16.msra.mxu1 %v3954_v7  ;;  %3498 = vmatprep.subr.bf16.mxu0 %v3955_v8  ;;  %v3971_v24 = vld [vmem:[%s5931_s3 + $0x70] sm:$0xff]   ;;  %v3975_v28 = vld [vmem:[%s5931_s3 + $0x78] sm:$0xff]   ;;  %v34_v33 = vld [vmem:[%s5928_s0] sm:$0xff] }
   0xa   :  { %3520 = vmatprep.subr.bf16.mxu1 %v3956_v9  ;;  %v3972_v25 = vld [vmem:[%s5931_s3 + $0xf0] sm:$0xff]   ;;  %v3976_v29 = vld [vmem:[%s5931_s3 + $0xf8] sm:$0xff]   ;;  %3422 = vst.sshfl [vmem:[#allocation2] sm:$0x3 pattern:$0x76325410] %v34_v33  ;;  %v401_v34 = vcombine.high %v34_v33, %v34_v33  ;;  %v2122_v41 = vcombine.low %v34_v33, %v34_v33  ;;  %v4372_v43 = vrot.slane %v34_v33, %v4369_v42 }
   0xb   :  { %v3973_v26 = vld [vmem:[%s5931_s3 + $0x30] sm:$0xff]   ;;  %v3977_v30 = vld [vmem:[%s5931_s3 + $0x38] sm:$0xff]   ;;  %v3980_v38 = vld [vmem:[%s5931_s3 + $0x140] sm:$0xff]  }
   0xc   :  { %3499 = vmatpush3.bf16.msra.mxu0 %v3957_v10  ;;  %v3974_v27 = vld [vmem:[%s5931_s3 + $0xb0] sm:$0xff]   ;;  %v3978_v32 = vld [vmem:[%s5931_s3 + $0xb8] sm:$0xff]   ;;  %3423 = vst.sshfl [vmem:[#allocation2 + $0x10] sm:$0x3 pattern:$0x76325410] %v401_v34  ;;  %v4375_v44 = vrot.slane %v2122_v41, %v4369_v42  ;;  %v4378_v45 = vrot.slane %v401_v34, %v4369_v42  ;;  %v4382_v46 = vcombine.high %v4372_v43, %v4372_v43 }
   0xd   :  { %3521 = vmatpush3.bf16.msra.mxu1 %v3958_v11  ;;  %3500 = vmatprep.subr.bf16.mxu0 %v3959_v12  ;;  %v3981_v39 = vld [vmem:[%s5931_s3 + $0x1c0] sm:$0xff]   ;;  %6006 = vst [vmem:[#allocation8_spill] sm:$0xff] %v4372_v43  ;;  %v443_v49 = vpack.c.bf16 %v4372_v43, %v4372_v43  ;;  %v3984_v53 = vld [vmem:[%s5931_s3 + $0x148] sm:$0xff]   ;;  %v3988_v58 = vld [vmem:[%s5931_s3 + $0x150] sm:$0xff]  }
   0xe   :  { %3522 = vmatprep.subr.bf16.mxu1 %v3960_v13  ;;  %6007 = vst [vmem:[#allocation9_spill] sm:$0xff] %v4378_v45  ;;  %6008 = vst [vmem:[#allocation10_spill] sm:$0xff] %v4382_v46  ;;  %v3982_v47 = vld [vmem:[%s5931_s3 + $0x100] sm:$0xff]   ;;  %v4389_v48 = vcombine.high %v4378_v45, %v4378_v45  ;;  %v444_v51 = vpack.c.bf16 %v4382_v46, %v4382_v46  ;;  %v445_v52 = vpack.c.bf16 %v4378_v45, %v4378_v45  ;;  %v3985_v55 = vld [vmem:[%s5931_s3 + $0x1c8] sm:$0xff]  }
   0xf   :  { %v3983_v50 = vld [vmem:[%s5931_s3 + $0x180] sm:$0xff]   ;;  %2206 = vst [vmem:[#allocation2 + $0x8] sm:$0x3] %v4382_v46  ;;  %v3986_v56 = vld [vmem:[%s5931_s3 + $0x108] sm:$0xff]   ;;  %v3989_v59 = vld [vmem:[%s5931_s3 + $0x1d0] sm:$0xff]  }
  0x10   :  { %3501 = vmatpush3.bf16.msra.mxu0 %v3961_v14  ;;  %6009 = vst [vmem:[#allocation11_spill] sm:$0xff] %v4389_v48  ;;  %v446_v54 = vpack.c.bf16 %v4389_v48, %v4389_v48  ;;  %2208 = vst [vmem:[#allocation2 + $0x18] sm:$0x3] %v4389_v48  ;;  %867 = vmatprep.mubr.bf16.mxu0 %v444_v51  ;;  %v3987_v57 = vld [vmem:[%s5931_s3 + $0x188] sm:$0xff]   ;;  %v3990_v60 = vld [vmem:[%s5931_s3 + $0x110] sm:$0xff]  }
  0x11   :  { %3523 = vmatpush3.bf16.msra.mxu1 %v3962_v15  ;;  %3502 = vmatprep.subr.bf16.mxu0 %v3963_v16  ;;  %v3991_v61 = vld [vmem:[%s5931_s3 + $0x190] sm:$0xff]   ;;  %v3992_v62 = vld [vmem:[%s5931_s3 + $0x158] sm:$0xff]   ;;  %v3996_v2 = vld [vmem:[%s5931_s3 + $0x160] sm:$0xff]  }
  0x12   :  { %3524 = vmatprep.subr.bf16.mxu1 %v3964_v17  ;;  %907 = vmatprep.mubr.bf16.mxu1 %v446_v54  ;;  %v3993_v63 = vld [vmem:[%s5931_s3 + $0x1d8] sm:$0xff]   ;;  %v3997_v3 = vld [vmem:[%s5931_s3 + $0x1e0] sm:$0xff]   ;;  %v4000_v6 = vld [vmem:[%s5931_s3 + $0x168] sm:$0xff]  }
  0x13   :  { %v3994_v0 = vld [vmem:[%s5931_s3 + $0x118] sm:$0xff]   ;;  %v3998_v4 = vld [vmem:[%s5931_s3 + $0x120] sm:$0xff]   ;;  %v4001_v7 = vld [vmem:[%s5931_s3 + $0x1e8] sm:$0xff]  }
  0x14   :  { %3503 = vmatpush3.bf16.msra.mxu0 %v3965_v18  ;;  %v3995_v1 = vld [vmem:[%s5931_s3 + $0x198] sm:$0xff]   ;;  %v3999_v5 = vld [vmem:[%s5931_s3 + $0x1a0] sm:$0xff]   ;;  %v4002_v8 = vld [vmem:[%s5931_s3 + $0x128] sm:$0xff]  }
  0x15   :  { %3525 = vmatpush3.bf16.msra.mxu1 %v3966_v19  ;;  %3504 = vmatprep.subr.bf16.mxu0 %v3967_v20  ;;  %v4003_v9 = vld [vmem:[%s5931_s3 + $0x1a8] sm:$0xff]   ;;  %v4004_v10 = vld [vmem:[%s5931_s3 + $0x170] sm:$0xff]   ;;  %v4008_v18 = vld [vmem:[%s5931_s3 + $0x178] sm:$0xff]  }
  0x16   :  { %3526 = vmatprep.subr.bf16.mxu1 %v3968_v21  ;;  %v4005_v11 = vld [vmem:[%s5931_s3 + $0x1f0] sm:$0xff]   ;;  %v35_v12 = vld [vmem:[%s5928_s0 + $0x8] sm:$0xff]  ;;  %v4009_v19 = vld [vmem:[%s5931_s3 + $0x1f8] sm:$0xff]  }
  0x17   :  { %v4006_v13 = vld [vmem:[%s5931_s3 + $0x130] sm:$0xff]   ;;  %v4477_v14 = vrot.slane %v35_v12, %v4369_v42  ;;  %v2132_v15 = vcombine.low %v35_v12, %v35_v12  ;;  %3424 = vst.sshfl [vmem:[#allocation2 + $0x20] sm:$0x3 pattern:$0x76325410] %v35_v12  ;;  %v418_v16 = vcombine.high %v35_v12, %v35_v12 }
  0x18   :  { %3505 = vmatpush3.bf16.msra.mxu0 %v3969_v22  ;;  %v4007_v17 = vld [vmem:[%s5931_s3 + $0x1b0] sm:$0xff]   ;;  %v4529_v33 = vld [vmem:[%s5929_s1] sm:$0x3] }
  0x19   :  { %3527 = vmatpush3.bf16.msra.mxu1 %v3970_v23  ;;  %3506 = vmatprep.subr.bf16.mxu0 %v3971_v24  ;;  %v4490_v20 = vcombine.high %v4477_v14, %v4477_v14  ;;  %v4493_v21 = vrot.slane %v2132_v15, %v4369_v42  ;;  %v4496_v22 = vrot.slane %v418_v16, %v4369_v42  ;;  %v4010_v23 = vld [vmem:[%s5931_s3 + $0x138] sm:$0xff]  }
  0x1a   :  { %3528 = vmatprep.subr.bf16.mxu1 %v3972_v25  ;;  %3425 = vst.sshfl [vmem:[#allocation2 + $0x30] sm:$0x3 pattern:$0x76325410] %v418_v16  ;;  %6013 = vst [vmem:[#allocation15_spill] sm:$0xff] %v4529_v33  ;;  %v1087_v34 = vpack.c.bf16 %v4529_v33, %v4529_v33 }
  0x1b   :  { %6010 = vst [vmem:[#allocation12_spill] sm:$0xff] %v4490_v20  ;;  %6011 = vst [vmem:[#allocation13_spill] sm:$0xff] %v4496_v22  ;;  %v448_v24 = vpack.c.bf16 %v4490_v20, %v4490_v20  ;;  %v4506_v25 = vcombine.high %v4496_v22, %v4496_v22 }
  0x1c   :  { %3507 = vmatpush3.bf16.msra.mxu0 %v3973_v26  ;;  %2210 = vst [vmem:[#allocation2 + $0x28] sm:$0x3] %v4490_v20  ;;  %v4011_v26 = vld [vmem:[%s5931_s3 + $0x1b8] sm:$0xff]  }
  0x1d   :  { %3529 = vmatpush3.bf16.msra.mxu1 %v3974_v27  ;;  %3508 = vmatprep.subr.bf16.mxu0 %v3975_v28  ;;  %6012 = vst [vmem:[#allocation14_spill] sm:$0xff] %v4506_v25  ;;  %v450_v27 = vpack.c.bf16 %v4506_v25, %v4506_v25  ;;  %2212 = vst [vmem:[#allocation2 + $0x38] sm:$0x3] %v4506_v25  ;;  %v447_v28 = vpack.c.bf16 %v4477_v14, %v4477_v14 }
  0x1e   :  { %3530 = vmatprep.subr.bf16.mxu1 %v3976_v29  ;;  %v4013_v29 = vld [vmem:[%s5933_s5] sm:$0xff]  }
  0x20   :  { %3509 = vmatpush3.bf16.msra.mxu0 %v3977_v30  ;;  %v449_v30 = vpack.c.bf16 %v4496_v22, %v4496_v22 }
  0x21   :  { %3531 = vmatpush3.bf16.msra.mxu1 %v3978_v32  ;;  %3538 = vmatprep.subr.bf16.mxu0 %v3980_v38  ;;  %v4014_v32 = vld [vmem:[%s5933_s5 + $0x8] sm:$0xff]  }
  0x22   :  { %3560 = vmatprep.subr.bf16.mxu1 %v3981_v39 }
  0x23   :  { %868 = vmatmul.mubr.bf16.vlgmr.msra.gmra.mrb[0].mxu0 %v443_v49 }
  0x24   :  { %908 = vmatmul.mubr.bf16.vlgmr.msra.gmra.mrb[0].mxu1 %v445_v52  ;;  %3539 = vmatpush3.bf16.msra.mxu0 %v3982_v47 }
  0x25   :  { %3561 = vmatpush3.bf16.msra.mxu1 %v3983_v50  ;;  %3540 = vmatprep.subr.bf16.mxu0 %v3984_v53 }
  0x26   :  { %3562 = vmatprep.subr.bf16.mxu1 %v3985_v55  ;;  %947 = vmatprep.mubr.bf16.mxu0 %v448_v24 }
  0x27   :  { %987 = vmatprep.mubr.bf16.mxu1 %v450_v27 }
  0x28   :  { %3541 = vmatpush3.bf16.msra.mxu0 %v3986_v56 }
  0x29   :  { %3563 = vmatpush3.bf16.msra.mxu1 %v3987_v57  ;;  %3542 = vmatprep.subr.bf16.mxu0 %v3988_v58 }
  0x2a   :  { %3564 = vmatprep.subr.bf16.mxu1 %v3989_v59 }
  0x2c   :  { %3543 = vmatpush3.bf16.msra.mxu0 %v3990_v60 }
  0x2d   :  { %3565 = vmatpush3.bf16.msra.mxu1 %v3991_v61  ;;  %3544 = vmatprep.subr.bf16.mxu0 %v3992_v62 }
  0x2e   :  { %3566 = vmatprep.subr.bf16.mxu1 %v3993_v63 }
  0x30   :  { %3545 = vmatpush3.bf16.msra.mxu0 %v3994_v0 }
  0x31   :  { %3567 = vmatpush3.bf16.msra.mxu1 %v3995_v1  ;;  %3546 = vmatprep.subr.bf16.mxu0 %v3996_v2 }
  0x32   :  { %3568 = vmatprep.subr.bf16.mxu1 %v3997_v3 }
  0x34   :  { %3547 = vmatpush3.bf16.msra.mxu0 %v3998_v4 }
  0x35   :  { %3569 = vmatpush3.bf16.msra.mxu1 %v3999_v5  ;;  %3548 = vmatprep.subr.bf16.mxu0 %v4000_v6 }
  0x36   :  { %3570 = vmatprep.subr.bf16.mxu1 %v4001_v7 }
  0x38   :  { %3549 = vmatpush3.bf16.msra.mxu0 %v4002_v8 }
  0x39   :  { %3571 = vmatpush3.bf16.msra.mxu1 %v4003_v9  ;;  %3550 = vmatprep.subr.bf16.mxu0 %v4004_v10 }
  0x3a   :  { %3572 = vmatprep.subr.bf16.mxu1 %v4005_v11 }
  0x3c   :  { %3551 = vmatpush3.bf16.msra.mxu0 %v4006_v13 }
  0x3d   :  { %3573 = vmatpush3.bf16.msra.mxu1 %v4007_v17  ;;  %3552 = vmatprep.subr.bf16.mxu0 %v4008_v18 }
  0x3e   :  { %3574 = vmatprep.subr.bf16.mxu1 %v4009_v19 }
  0x40   :  { %3553 = vmatpush3.bf16.msra.mxu0 %v4010_v23 }
  0x41   :  { %3575 = vmatpush3.bf16.msra.mxu1 %v4011_v26  ;;  %3860 = vmatprep.subr.bf16.mxu0 %v5938_v31 }
  0x42   :  { %3880 = vmatprep.subr.bf16.mxu1 %v5938_v31 }
  0x43   :  { %948 = vmatmul.mubr.bf16.vlgmr.msra.gmra.mrb[4].mxu0 %v447_v28 }
  0x44   :  { %988 = vmatmul.mubr.bf16.vlgmr.msra.gmra.mrb[4].mxu1 %v449_v30  ;;  %3876 = vmatprep.mubr.msk.bf16.mxu0 %vm4206_vm1, %v5938_v31 }
  0x45   :  { %3881 = vmatpush3.bf16.msra.mxu1 %v4013_v29  ;;  %3884 = vmatprep.mubr.msk.bf16.mxu1 %vm4206_vm1, %v5938_v31 }
  0x46   :  { %3882 = vmatprep.subr.bf16.mxu1 %v5938_v31 }
  0x49   :  { %3883 = vmatpush3.bf16.msra.mxu1 %v4014_v32 }
  0x4c   :  { %3885 = vmatmul.mubr.msk.bf16.vlgmr.msra.gmra.mrb[8].mxu1 %vm1100_vm0, %v1087_v34 }
  0x4d   :  { %14 = vsyncpa [#allocation5], 0  ;;  %v4542_v35 = vld [vmem:[%s5932_s4] sm:$0xff]   ;;  %v4564_v47 = vld [vmem:[%s5932_s4 + $0x8] sm:$0xff]   ;;  %v5940_v30 = vmov 0   ;;  %vm2269_vm4 = vcmask 254976  }
  0x4e   :  { %v185_v36 = vld [vmem:[%s5934_s6] sm:$0xff]  ;;  %3861 = vmatpush3.bf16.msra.mxu0 %v4542_v35  ;;  %v4586_v54 = vld [vmem:[%s5932_s4 + $0x10] sm:$0xff]   ;;  %v4605_v59 = vld [vmem:[%s5932_s4 + $0x18] sm:$0xff]   ;;  %1541 = vmatprep.mubr.bf16.mxu1 %v5940_v30  ;;  %2271 = vst.msk [vmem:[#allocation3 + $0x2] sm:$0x3] %vm2269_vm4, %v4529_v33  ;;  %vm2272_vm5 = vcmask 261126  }
  0x4f   :  { %v189_v38 = vld [vmem:[%s5934_s6 + $0x20] sm:$0xff]  ;;  %3862 = vmatprep.subr.bf16.mxu0 %v5938_v31  ;;  %v4637_v2 = vld [vmem:[%s5932_s4 + $0x28] sm:$0xff]   ;;  %v4655_v7 = vld [vmem:[%s5932_s4 + $0x30] sm:$0xff]   ;;  %vm3205_vm8 = vcmask 1041408   ;;  %vm2904_vm10 = vcmask 1045504   ;;  %vm3161_vm11 = vcmask 259072  }
  0x50   :  { %v4550_v39 = vcombine.low %v185_v36, %v189_v38  ;;  %v4552_v40 = vcombine.high %v185_v36, %v189_v38  ;;  %v193_v41 = vld [vmem:[%s5934_s6 + $0x40] sm:$0xff]  ;;  %v4674_v12 = vld [vmem:[%s5932_s4 + $0x38] sm:$0xff]   ;;  %v186_v17 = vld [vmem:[%s5934_s6 + $0x8] sm:$0xff]  ;;  %s4209_s27 = smov 96   ;;  %vm2914_vm14 = vcmask 5120   ;;  %s3271_s11 = sshll.u32 %s5937_s9, 4  ;;  %s3272_s11 = int_to_ptr.vmem [resolvable:$true] %s3271_s11 }
  0x51   :  { %v197_v42 = vld [vmem:[%s5934_s6 + $0x60] sm:$0xff]  ;;  %v190_v18 = vld [vmem:[%s5934_s6 + $0x28] sm:$0xff]  ;;  %v187_v26 = vld [vmem:[%s5934_s6 + $0x10] sm:$0xff]  ;;  %s4190_s1 = scalar_lea.vmem %s3272_s11, 16  ;;  %p4195_p1 = scmp.lt.s32.totalorder %s3272_s11, %s3272_s11 }
  0x52   :  { %v4566_v49 = vcombine.high %v193_v41, %v197_v42  ;;  %v201_v50 = vld [vmem:[%s5934_s6 + $0x80] sm:$0xff]  ;;  %1509 = vmatprep.subr.bf16.mxu1 %v4552_v40  ;;  %v4577_v52 = vcombine.low %v193_v41, %v197_v42  ;;  %3863 = vmatpush3.bf16.msra.mxu0 %v4564_v47  ;;  %v4694_v23 = vcombine.high %v186_v17, %v190_v18  ;;  %v191_v27 = vld [vmem:[%s5934_s6 + $0x30] sm:$0xff]  ;;  %p4191_p0 = scmp.ne.s32.totalorder %s3272_s11, %s4190_s1  ;;  %p4196_p2 = scmp.lt.s32.totalorder %s4190_s1, %s4190_s1 }
  0x53   :  { %v205_v51 = vld [vmem:[%s5934_s6 + $0xa0] sm:$0xff]  ;;  %1510 = vmatpush1.bf16.msra.mxu1 %v4550_v39  ;;  %3864 = vmatprep.subr.bf16.mxu0 %v5938_v31  ;;  %v4697_v24 = vcombine.low %v186_v17, %v190_v18  ;;  %v4707_v28 = vcombine.high %v187_v26, %v191_v27  ;;  %v4709_v29 = vcombine.low %v187_v26, %v191_v27  ;;  %v223_v25 = vld [vmem:[%s5934_s6 + $0x130] sm:$0xff] }
  0x54   :  { %1511 = vmatprep.subr.bf16.mxu1 %v4566_v49  ;;  %v4580_v53 = vcombine.high %v201_v50, %v205_v51  ;;  %v209_v55 = vld [vmem:[%s5934_s6 + $0xc0] sm:$0xff]  ;;  %v4596_v57 = vcombine.low %v201_v50, %v205_v51  ;;  %v227_v48 = vld [vmem:[%s5934_s6 + $0x150] sm:$0xff]  ;;  %p4197_p3 = por %p4196_p2, %p4195_p1 }
  0x55   :  { %v213_v56 = vld [vmem:[%s5934_s6 + $0xe0] sm:$0xff]  ;;  %v231_v45 = vld [vmem:[%s5934_s6 + $0x170] sm:$0xff] }
  0x56   :  { %v4599_v58 = vcombine.high %v209_v55, %v213_v56  ;;  %3865 = vmatpush3.bf16.msra.mxu0 %v4586_v54  ;;  %v217_v60 = vld [vmem:[%s5934_s6 + $0x100] sm:$0xff]  ;;  %v4615_v62 = vcombine.low %v209_v55, %v213_v56  ;;  %v4850_v46 = vcombine.high %v227_v48, %v231_v45  ;;  %p4198_p4 = pnand %p4197_p3, %p4191_p0 }
  0x57   :  { %1512 = vmatpush1.bf16.msra.mxu1 %v4577_v52  ;;  %v221_v61 = vld [vmem:[%s5934_s6 + $0x120] sm:$0xff]  ;;  %3866 = vmatprep.subr.bf16.mxu0 %v5938_v31 }
  0x58   :  { %1513 = vmatprep.subr.bf16.mxu1 %v4580_v53  ;;  %v4618_v63 = vcombine.high %v217_v60, %v221_v61  ;;  %v4624_v0 = vld [vmem:[%s5932_s4 + $0x20] sm:$0xff]   ;;  %v4628_v1 = vcombine.low %v217_v60, %v221_v61  ;;  %6030 = vst [vmem:[#allocation32_spill] sm:$0xff] %v4850_v46 }
  0x59   :  { %v225_v3 = vld [vmem:[%s5934_s6 + $0x140] sm:$0xff] }
  0x5a   :  { %3867 = vmatpush3.bf16.msra.mxu0 %v4605_v59  ;;  %v229_v4 = vld [vmem:[%s5934_s6 + $0x160] sm:$0xff] }
  0x5b   :  { %1514 = vmatpush1.bf16.msra.mxu1 %v4596_v57  ;;  %3868 = vmatprep.subr.bf16.mxu0 %v5938_v31  ;;  %v4646_v5 = vcombine.high %v225_v3, %v229_v4  ;;  %v4648_v6 = vcombine.low %v225_v3, %v229_v4  ;;  %v233_v8 = vld [vmem:[%s5934_s6 + $0x180] sm:$0xff] }
  0x5c   :  { %1515 = vmatprep.subr.bf16.mxu1 %v4599_v58  ;;  %v237_v9 = vld [vmem:[%s5934_s6 + $0x1a0] sm:$0xff] }
  0x5d   :  { %v4665_v10 = vcombine.high %v233_v8, %v237_v9  ;;  %v4667_v11 = vcombine.low %v233_v8, %v237_v9  ;;  %v241_v13 = vld [vmem:[%s5934_s6 + $0x1c0] sm:$0xff] }
  0x5e   :  { %3869 = vmatpush3.bf16.msra.mxu0 %v4624_v0  ;;  %v245_v15 = vld [vmem:[%s5934_s6 + $0x1e0] sm:$0xff] }
  0x5f   :  { %1516 = vmatpush1.bf16.msra.mxu1 %v4615_v62  ;;  %3870 = vmatprep.subr.bf16.mxu0 %v5938_v31  ;;  %v4684_v16 = vcombine.high %v241_v13, %v245_v15  ;;  %v4692_v19 = vcombine.low %v241_v13, %v245_v15  ;;  %v4716_v36 = vld [vmem:[%s5930_s2] ss:$0 sm:$0xff] }
  0x60   :  { %1517 = vmatprep.subr.bf16.mxu1 %v4618_v63 }
  0x62   :  { %3871 = vmatpush3.bf16.msra.mxu0 %v4637_v2 }
  0x63   :  { %1518 = vmatpush1.bf16.msra.mxu1 %v4628_v1  ;;  %3872 = vmatprep.subr.bf16.mxu0 %v5938_v31 }
  0x64   :  { %1519 = vmatprep.subr.bf16.mxu1 %v4646_v5 }
  0x66   :  { %3873 = vmatpush3.bf16.msra.mxu0 %v4655_v7 }
  0x67   :  { %1520 = vmatpush1.bf16.msra.mxu1 %v4648_v6  ;;  %3874 = vmatprep.subr.bf16.mxu0 %v5938_v31 }
  0x68   :  { %1521 = vmatprep.subr.bf16.mxu1 %v4665_v10 }
  0x6a   :  { %3875 = vmatpush3.bf16.msra.mxu0 %v4674_v12 }
  0x6b   :  { %1522 = vmatpush1.bf16.msra.mxu1 %v4667_v11  ;;  %1550 = vmatprep.subr.bf16.mxu0 %v4694_v23 }
  0x6c   :  { %1523 = vmatprep.subr.bf16.mxu1 %v4684_v16 }
  0x6f   :  { %1524 = vmatpush1.bf16.msra.mxu1 %v4692_v19 }
  0x70   :  { %1591 = vmatprep.subr.bf16.mxu1 %v4707_v28 }
  0xf6   :  { %v3510_v32 = vpop.f32.mrb[0].mxu0 }
  0xf7   :  { %v3532_v34 = vpop.f32.mrb[0].mxu1  ;;  %v3511_v38 = vpop.f32.mrb[1].mxu0 }
  0xf8   :  { %v3512_v41 = vadd.f32 %v3511_v38, %v3510_v32  ;;  %v3533_v42 = vpop.f32.mrb[1].mxu1  ;;  %v3513_v50 = vpop.f32.mrb[2].mxu0 }
  0xf9   :  { %v3534_v51 = vadd.f32 %v3533_v42, %v3532_v34  ;;  %v3535_v55 = vpop.f32.mrb[2].mxu1  ;;  %v3514_v56 = vpop.f32.mrb[3].mxu0  ;;  %v4722_v34 = vld [vmem:[%s5930_s2 + $0x2] ss:$0 sm:$0xff]  ;;  %v194_v42 = vld [vmem:[%s5934_s6 + $0x48] sm:$0xff] }
  0xfa   :  { %v870_v60 = vadd.f32 %v3512_v41, %v4716_v36  ;;  %v3536_v61 = vpop.f32.mrb[3].mxu1  ;;  %v198_v50 = vld [vmem:[%s5934_s6 + $0x68] sm:$0xff] }
  0xfb   :  { %v4731_v61 = vcombine.high %v194_v42, %v198_v50 }
  0xfc   :  { %v910_v3 = vadd.f32 %v3534_v51, %v870_v60 }
 0x116   :  { %v3554_v4 = vpop.f32.mrb[4].mxu0 }
 0x117   :  { %v3576_v8 = vpop.f32.mrb[4].mxu1  ;;  %v3555_v9 = vpop.f32.mrb[5].mxu0 }
 0x118   :  { %v3556_v13 = vadd.f32 %v3555_v9, %v3554_v4  ;;  %v3577_v15 = vpop.f32.mrb[5].mxu1  ;;  %v3557_v17 = vpop.f32.mrb[6].mxu0  ;;  %v199_v4 = vld [vmem:[%s5934_s6 + $0x70] sm:$0xff] }
 0x119   :  { %v3578_v18 = vadd.f32 %v3577_v15, %v3576_v8  ;;  %v3579_v26 = vpop.f32.mrb[6].mxu1  ;;  %v3558_v27 = vpop.f32.mrb[7].mxu0  ;;  %v206_v15 = vld [vmem:[%s5934_s6 + $0xa8] sm:$0xff] }
 0x11a   :  { %v950_v31 = vadd.f32 %v3556_v13, %v910_v3  ;;  %v3580_v32 = vpop.f32.mrb[7].mxu1  ;;  %v195_v3 = vld [vmem:[%s5934_s6 + $0x50] sm:$0xff]  ;;  %v202_v13 = vld [vmem:[%s5934_s6 + $0x88] sm:$0xff]  ;;  %v4746_v26 = vcombine.low %v194_v42, %v198_v50 }
 0x11b   :  { %v4752_v32 = vcombine.high %v195_v3, %v199_v4  ;;  %v210_v42 = vld [vmem:[%s5934_s6 + $0xc8] sm:$0xff] }
 0x11c   :  { %v990_v38 = vadd.f32 %v3578_v18, %v950_v31  ;;  %v214_v50 = vld [vmem:[%s5934_s6 + $0xe8] sm:$0xff] }
 0x11d   :  { %6014 = vst [vmem:[#allocation16_spill] sm:$0xff] %v4752_v32 }
 0x11e   :  { %vm995_vm2 = vcmp.gt.f32.partialorder %v990_v38, 0.0  ;;  %v996_v41 = vmul.f32 0.2, %v990_v38 }
 0x11f   :  { %v1138_v51 = vpop.f32.mrb[8].mxu1 }
 0x120   :  { %v997_v55 = vsel %vm995_vm2, %v990_v38, %v996_v41  ;;  %v1139_v56 = vadd.f32 %v1138_v51, %v4722_v34  ;;  %v3886_v31 = vpop.f32.mrb[9].mxu1  ;;  %v4754_v38 = vcombine.high %v202_v13, %v206_v15  ;;  %v203_v41 = vld [vmem:[%s5934_s6 + $0x90] sm:$0xff] }
 0x121   :  { %v998_v60 = vpack.c.bf16 %v997_v55, %v997_v55  ;;  %v1141_v8 = vpop.f32.mrb[10].mxu1  ;;  %v207_v51 = vld [vmem:[%s5934_s6 + $0xb0] sm:$0xff]  ;;  %v4771_v55 = vcombine.low %v195_v3, %v199_v4  ;;  %v218_v3 = vld [vmem:[%s5934_s6 + $0x108] sm:$0xff] }
 0x122   :  { %vm1144_vm3 = vcmp.gt.f32.partialorder %v1139_v56, 0.0  ;;  %v1145_v9 = vmul.f32 0.2, %v1139_v56  ;;  %v3887_v17 = vpop.f32.mrb[11].mxu1  ;;  %6015 = vst [vmem:[#allocation17_spill] sm:$0xff] %v4754_v38  ;;  %v4777_v31 = vcombine.high %v203_v41, %v207_v51  ;;  %v211_v8 = vld [vmem:[%s5934_s6 + $0xd0] sm:$0xff] }
 0x123   :  { %3877 = vmatmul.mubr.bf16.vlgmr.msra.gmra.mrb[8].mxu0 %v998_v60  ;;  %6016 = vst [vmem:[#allocation18_spill] sm:$0xff] %v4771_v55  ;;  %v4779_v60 = vcombine.high %v210_v42, %v214_v50  ;;  %v222_v4 = vld [vmem:[%s5934_s6 + $0x128] sm:$0xff] }
 0x124   :  { %v1146_v18 = vsel %vm1144_vm3, %v1139_v56, %v1145_v9  ;;  %1551 = vmatpush1.bf16.msra.mxu0 %v4697_v24  ;;  %1582 = vmatprep.mubr.bf16.mxu0 %v5940_v30  ;;  %v4773_v56 = vcombine.low %v202_v13, %v206_v15  ;;  %6018 = vst [vmem:[#allocation20_spill] sm:$0xff] %v4777_v31  ;;  %v215_v9 = vld [vmem:[%s5934_s6 + $0xf0] sm:$0xff] }
 0x125   :  { %v4749_v27 = vpack.c.bf16 %v1146_v18, %v1146_v18  ;;  %1552 = vmatprep.subr.bf16.mxu0 %v4731_v61  ;;  %6019 = vst [vmem:[#allocation21_spill] sm:$0xff] %v4779_v60  ;;  %v4796_v13 = vcombine.low %v203_v41, %v207_v51  ;;  %v4798_v15 = vcombine.low %v210_v42, %v214_v50  ;;  %v226_v41 = vld [vmem:[%s5934_s6 + $0x148] sm:$0xff] }
 0x126   :  { %6017 = vst [vmem:[#allocation19_spill] sm:$0xff] %v4773_v56  ;;  %v4802_v17 = vcombine.high %v211_v8, %v215_v9  ;;  %v4804_v18 = vcombine.high %v218_v3, %v222_v4  ;;  %v230_v51 = vld [vmem:[%s5934_s6 + $0x168] sm:$0xff]  ;;  %v4820_v42 = vcombine.low %v211_v8, %v215_v9  ;;  %v4822_v50 = vcombine.low %v218_v3, %v222_v4 }
 0x127   :  { %1542 = vmatmul.mubr.bf16.vlgmr.msra.gmra.mrb[12].mxu1 %v4749_v27  ;;  %6020 = vst [vmem:[#allocation22_spill] sm:$0xff] %v4796_v13  ;;  %6021 = vst [vmem:[#allocation23_spill] sm:$0xff] %v4798_v15  ;;  %v4828_v20 = vcombine.high %v226_v41, %v230_v51  ;;  %v234_v8 = vld [vmem:[%s5934_s6 + $0x188] sm:$0xff]  ;;  %v4846_v4 = vcombine.low %v226_v41, %v230_v51  ;;  %v4868_v41 = vcombine.low %v227_v48, %v231_v45  ;;  %v188_v45 = vld [vmem:[%s5934_s6 + $0x18] sm:$0xff] }
 0x128   :  { %1592 = vmatpush1.bf16.msra.mxu1 %v4709_v29  ;;  %1553 = vmatpush1.bf16.msra.mxu0 %v4746_v26  ;;  %6022 = vst [vmem:[#allocation24_spill] sm:$0xff] %v4802_v17  ;;  %6023 = vst [vmem:[#allocation25_spill] sm:$0xff] %v4804_v18  ;;  %v238_v9 = vld [vmem:[%s5934_s6 + $0x1a8] sm:$0xff]  ;;  %v192_v48 = vld [vmem:[%s5934_s6 + $0x38] sm:$0xff] }
 0x129   :  { %1593 = vmatprep.subr.bf16.mxu1 %v4752_v32  ;;  %1554 = vmatprep.subr.bf16.mxu0 %v4754_v38  ;;  %6024 = vst [vmem:[#allocation26_spill] sm:$0xff] %v4820_v42  ;;  %6025 = vst [vmem:[#allocation27_spill] sm:$0xff] %v4822_v50  ;;  %v4870_v51 = vcombine.low %v234_v8, %v238_v9 }
 0x12a   :  { %1623 = vmatprep.mubr.bf16.mxu1 %v5940_v30  ;;  %v219_v30 = vld [vmem:[%s5934_s6 + $0x110] sm:$0xff]  ;;  %6027 = vst [vmem:[#allocation29_spill] sm:$0xff] %v4828_v20  ;;  %6029 = vst [vmem:[#allocation31_spill] sm:$0xff] %v4846_v4 }
 0x12b   :  { %v4826_v22 = vcombine.high %v219_v30, %v223_v25  ;;  %v4844_v3 = vcombine.low %v219_v30, %v223_v25  ;;  %v242_v25 = vld [vmem:[%s5934_s6 + $0x1c8] sm:$0xff]  ;;  %6032 = vst [vmem:[#allocation34_spill] sm:$0xff] %v4868_v41  ;;  %6033 = vst [vmem:[#allocation35_spill] sm:$0xff] %v4870_v51 }
 0x12c   :  { %1594 = vmatpush1.bf16.msra.mxu1 %v4771_v55  ;;  %1555 = vmatpush1.bf16.msra.mxu0 %v4773_v56  ;;  %v246_v30 = vld [vmem:[%s5934_s6 + $0x1e8] sm:$0xff] }
 0x12d   :  { %1595 = vmatprep.subr.bf16.mxu1 %v4777_v31  ;;  %1556 = vmatprep.subr.bf16.mxu0 %v4779_v60  ;;  %6026 = vst [vmem:[#allocation28_spill] sm:$0xff] %v4826_v22  ;;  %6028 = vst [vmem:[#allocation30_spill] sm:$0xff] %v4844_v3 }
 0x130   :  { %1596 = vmatpush1.bf16.msra.mxu1 %v4796_v13  ;;  %1557 = vmatpush1.bf16.msra.mxu0 %v4798_v15 }
 0x131   :  { %1597 = vmatprep.subr.bf16.mxu1 %v4802_v17  ;;  %1558 = vmatprep.subr.bf16.mxu0 %v4804_v18  ;;  %v4852_v17 = vcombine.high %v234_v8, %v238_v9  ;;  %v235_v18 = vld [vmem:[%s5934_s6 + $0x190] sm:$0xff]  ;;  %v4894_v9 = vcombine.low %v242_v25, %v246_v30 }
 0x133   :  { %6031 = vst [vmem:[#allocation33_spill] sm:$0xff] %v4852_v17  ;;  %6037 = vst [vmem:[#allocation39_spill] sm:$0xff] %v4894_v9 }
 0x134   :  { %1598 = vmatpush1.bf16.msra.mxu1 %v4820_v42  ;;  %1559 = vmatpush1.bf16.msra.mxu0 %v4822_v50  ;;  %v239_v42 = vld [vmem:[%s5934_s6 + $0x1b0] sm:$0xff] }
 0x135   :  { %1599 = vmatprep.subr.bf16.mxu1 %v4826_v22  ;;  %1560 = vmatprep.subr.bf16.mxu0 %v4828_v20  ;;  %v4874_v22 = vcombine.high %v235_v18, %v239_v42  ;;  %v4876_v20 = vcombine.high %v242_v25, %v246_v30  ;;  %v243_v50 = vld [vmem:[%s5934_s6 + $0x1d0] sm:$0xff]  ;;  %v4892_v8 = vcombine.low %v235_v18, %v239_v42  ;;  %v204_v30 = vld [vmem:[%s5934_s6 + $0x98] sm:$0xff] }
 0x136   :  { %v4912_v42 = vcombine.low %v188_v45, %v192_v48 }
 0x137   :  { %6034 = vst [vmem:[#allocation36_spill] sm:$0xff] %v4874_v22  ;;  %6035 = vst [vmem:[#allocation37_spill] sm:$0xff] %v4876_v20 }
 0x138   :  { %1600 = vmatpush1.bf16.msra.mxu1 %v4844_v3  ;;  %1561 = vmatpush1.bf16.msra.mxu0 %v4846_v4  ;;  %v247_v3 = vld [vmem:[%s5934_s6 + $0x1f0] sm:$0xff]  ;;  %6036 = vst [vmem:[#allocation38_spill] sm:$0xff] %v4892_v8  ;;  %v196_v4 = vld [vmem:[%s5934_s6 + $0x58] sm:$0xff]  ;;  %6041 = vst [vmem:[#allocation43_spill] sm:$0xff] %v4912_v42 }
 0x139   :  { %1601 = vmatprep.subr.bf16.mxu1 %v4850_v46  ;;  %1562 = vmatprep.subr.bf16.mxu0 %v4852_v17  ;;  %v4898_v46 = vcombine.high %v243_v50, %v247_v3  ;;  %v4900_v17 = vcombine.high %v188_v45, %v192_v48  ;;  %v4910_v18 = vcombine.low %v243_v50, %v247_v3  ;;  %v6045_v45 = vmov 0   ;;  %v212_v48 = vld [vmem:[%s5934_s6 + $0xd8] sm:$0xff] }
 0x13b   :  { %6038 = vst [vmem:[#allocation40_spill] sm:$0xff] %v4898_v46  ;;  %6039 = vst [vmem:[#allocation41_spill] sm:$0xff] %v4900_v17 }
 0x13c   :  { %1602 = vmatpush1.bf16.msra.mxu1 %v4868_v41  ;;  %1563 = vmatpush1.bf16.msra.mxu0 %v4870_v51  ;;  %v200_v41 = vld [vmem:[%s5934_s6 + $0x78] sm:$0xff]  ;;  %6040 = vst [vmem:[#allocation42_spill] sm:$0xff] %v4910_v18 }
 0x13d   :  { %1603 = vmatprep.subr.bf16.mxu1 %v4874_v22  ;;  %1564 = vmatprep.subr.bf16.mxu0 %v4876_v20  ;;  %v4916_v25 = vcombine.high %v196_v4, %v200_v41  ;;  %v4927_v50 = vcombine.low %v196_v4, %v200_v41  ;;  %v4124_v41 = vld [vmem:[%s5931_s3] sm:$0xff]  }
 0x13f   :  { %6042 = vst [vmem:[#allocation44_spill] sm:$0xff] %v4916_v25  ;;  %6043 = vst [vmem:[#allocation45_spill] sm:$0xff] %v4927_v50 }
 0x140   :  { %1604 = vmatpush1.bf16.msra.mxu1 %v4892_v8  ;;  %1565 = vmatpush1.bf16.msra.mxu0 %v4894_v9  ;;  %v208_v8 = vld [vmem:[%s5934_s6 + $0xb8] sm:$0xff] }
 0x141   :  { %1605 = vmatprep.subr.bf16.mxu1 %v4898_v46  ;;  %1632 = vmatprep.subr.bf16.mxu0 %v4900_v17  ;;  %v4930_v3 = vcombine.high %v204_v30, %v208_v8  ;;  %v216_v46 = vld [vmem:[%s5934_s6 + $0xf8] sm:$0xff]  ;;  %v4944_v4 = vcombine.low %v204_v30, %v208_v8 }
 0x142   :  { %v224_v8 = vld [vmem:[%s5934_s6 + $0x138] sm:$0xff]  ;;  %v4962_v30 = vcombine.low %v212_v48, %v216_v46 }
 0x143   :  { %1583 = vmatmul.mubr.bf16.vlgmr.msra.gmra.mrb[12].mxu0 %v4749_v27  ;;  %6044 = vst [vmem:[#allocation46_spill] sm:$0xff] %v4930_v3  ;;  %6046 = vst [vmem:[#allocation47_spill] sm:$0xff] %v4944_v4 }
 0x144   :  { %1606 = vmatpush1.bf16.msra.mxu1 %v4910_v18  ;;  %1633 = vmatpush1.bf16.msra.mxu0 %v4912_v42  ;;  %v4123_v18 = vld [vmem:[%s5931_s3 + $0x40] sm:$0xff]   ;;  %v4125_v42 = vld [vmem:[%s5931_s3 + $0x48] sm:$0xff]   ;;  %6048 = vst [vmem:[#allocation49_spill] sm:$0xff] %v4962_v30 }
 0x145   :  { %1634 = vmatprep.subr.bf16.mxu0 %v4916_v25  ;;  %1664 = vmatprep.mubr.bf16.mxu0 %v6045_v45  ;;  %v4950_v25 = vcombine.high %v212_v48, %v216_v46  ;;  %v232_v46 = vld [vmem:[%s5934_s6 + $0x178] sm:$0xff] }
 0x146   :  { %3594 = vmatprep.subr.bf16.mxu1 %v4123_v18  ;;  %v220_v18 = vld [vmem:[%s5934_s6 + $0x118] sm:$0xff] }
 0x147   :  { %1624 = vmatmul.mubr.bf16.vlgmr.msra.gmra.mrb[16].mxu1 %v4749_v27  ;;  %6047 = vst [vmem:[#allocation48_spill] sm:$0xff] %v4950_v25  ;;  %v4980_v48 = vcombine.low %v220_v18, %v224_v8 }
 0x148   :  { %1635 = vmatpush1.bf16.msra.mxu0 %v4927_v50  ;;  %3595 = vmatpush3.bf16.msra.mxu1 %v4124_v41  ;;  %v4126_v41 = vld [vmem:[%s5931_s3 + $0x8] sm:$0xff]  }
 0x149   :  { %1636 = vmatprep.subr.bf16.mxu0 %v4930_v3  ;;  %3596 = vmatprep.subr.bf16.mxu1 %v4125_v42  ;;  %v4968_v42 = vcombine.high %v220_v18, %v224_v8  ;;  %v4127_v3 = vld [vmem:[%s5931_s3 + $0x50] sm:$0xff]   ;;  %6050 = vst [vmem:[#allocation51_spill] sm:$0xff] %v4980_v48  ;;  %v240_v18 = vld [vmem:[%s5934_s6 + $0x1b8] sm:$0xff] }
 0x14b   :  { %6049 = vst [vmem:[#allocation50_spill] sm:$0xff] %v4968_v42 }
 0x14c   :  { %1637 = vmatpush1.bf16.msra.mxu0 %v4944_v4  ;;  %3597 = vmatpush3.bf16.msra.mxu1 %v4126_v41  ;;  %v228_v4 = vld [vmem:[%s5934_s6 + $0x158] sm:$0xff]  ;;  %v4128_v41 = vld [vmem:[%s5931_s3 + $0x10] sm:$0xff]  }
 0x14d   :  { %1638 = vmatprep.subr.bf16.mxu0 %v4950_v25  ;;  %3598 = vmatprep.subr.bf16.mxu1 %v4127_v3  ;;  %v4986_v3 = vcombine.high %v228_v4, %v232_v46  ;;  %v4129_v25 = vld [vmem:[%s5931_s3 + $0x58] sm:$0xff]   ;;  %v4998_v8 = vcombine.low %v228_v4, %v232_v46 }
 0x14e   :  { %v248_v4 = vld [vmem:[%s5934_s6 + $0x1f8] sm:$0xff] }
 0x14f   :  { %6051 = vst [vmem:[#allocation52_spill] sm:$0xff] %v4986_v3  ;;  %6052 = vst [vmem:[#allocation53_spill] sm:$0xff] %v4998_v8 }
 0x150   :  { %1639 = vmatpush1.bf16.msra.mxu0 %v4962_v30  ;;  %3599 = vmatpush3.bf16.msra.mxu1 %v4128_v41  ;;  %v236_v30 = vld [vmem:[%s5934_s6 + $0x198] sm:$0xff] }
 0x151   :  { %1640 = vmatprep.subr.bf16.mxu0 %v4968_v42  ;;  %3600 = vmatprep.subr.bf16.mxu1 %v4129_v25  ;;  %v4130_v41 = vld [vmem:[%s5931_s3 + $0x18] sm:$0xff]   ;;  %v5004_v25 = vcombine.high %v236_v30, %v240_v18  ;;  %v4131_v42 = vld [vmem:[%s5931_s3 + $0x60] sm:$0xff]   ;;  %v5016_v46 = vcombine.low %v236_v30, %v240_v18  ;;  %v4134_v30 = vld [vmem:[%s5931_s3 + $0x28] sm:$0xff]  }
 0x152   :  { %v4135_v18 = vld [vmem:[%s5931_s3 + $0x70] sm:$0xff]  }
 0x153   :  { %6053 = vst [vmem:[#allocation54_spill] sm:$0xff] %v5004_v25  ;;  %6054 = vst [vmem:[#allocation55_spill] sm:$0xff] %v5016_v46 }
 0x154   :  { %1641 = vmatpush1.bf16.msra.mxu0 %v4980_v48  ;;  %3601 = vmatpush3.bf16.msra.mxu1 %v4130_v41  ;;  %v244_v48 = vld [vmem:[%s5934_s6 + $0x1d8] sm:$0xff]  ;;  %v4132_v41 = vld [vmem:[%s5931_s3 + $0x20] sm:$0xff]  }
 0x155   :  { %1642 = vmatprep.subr.bf16.mxu0 %v4986_v3  ;;  %3602 = vmatprep.subr.bf16.mxu1 %v4131_v42  ;;  %v5022_v42 = vcombine.high %v244_v48, %v248_v4  ;;  %v4133_v3 = vld [vmem:[%s5931_s3 + $0x68] sm:$0xff]   ;;  %v5028_v50 = vcombine.low %v244_v48, %v248_v4  ;;  %v4137_v48 = vld [vmem:[%s5931_s3 + $0x78] sm:$0xff]   ;;  %v4138_v4 = vld [vmem:[%s5931_s3 + $0xc0] sm:$0xff]  }
 0x157   :  { %6055 = vst [vmem:[#allocation56_spill] sm:$0xff] %v5022_v42  ;;  %6056 = vst [vmem:[#allocation57_spill] sm:$0xff] %v5028_v50 }
 0x158   :  { %1643 = vmatpush1.bf16.msra.mxu0 %v4998_v8  ;;  %3603 = vmatpush3.bf16.msra.mxu1 %v4132_v41  ;;  %v4139_v41 = vld [vmem:[%s5931_s3 + $0x38] sm:$0xff]  }
 0x159   :  { %1644 = vmatprep.subr.bf16.mxu0 %v5004_v25  ;;  %3604 = vmatprep.subr.bf16.mxu1 %v4133_v3  ;;  %v4136_v3 = vld [vmem:[%s5931_s3 + $0x30] sm:$0xff]  }
 0x15c   :  { %1645 = vmatpush1.bf16.msra.mxu0 %v5016_v46  ;;  %3605 = vmatpush3.bf16.msra.mxu1 %v4134_v30  ;;  %v4140_v30 = vld [vmem:[%s5931_s3 + $0x80] sm:$0xff]  }
 0x15d   :  { %1646 = vmatprep.subr.bf16.mxu0 %v5022_v42  ;;  %3606 = vmatprep.subr.bf16.mxu1 %v4135_v18  ;;  %v4141_v18 = vld [vmem:[%s5931_s3 + $0x140] sm:$0xff]   ;;  %v2201_v42 = vrot.slane %v4529_v33, 2 }
 0x160   :  { %1647 = vmatpush1.bf16.msra.mxu0 %v5028_v50  ;;  %3607 = vmatpush3.bf16.msra.mxu1 %v4136_v3  ;;  %v4142_v3 = vld [vmem:[%s5931_s3 + $0xc8] sm:$0xff]  }
 0x161   :  { %3608 = vmatprep.subr.bf16.mxu1 %v4137_v48  ;;  %3616 = vmatprep.subr.bf16.mxu0 %v4138_v4  ;;  %v4144_v48 = vld [vmem:[%s5931_s3 + $0xd0] sm:$0xff]  }
 0x162   :  { %v4145_v4 = vld [vmem:[%s5931_s3 + $0x90] sm:$0xff]  }
 0x163   :  { %1665 = vmatmul.mubr.bf16.vlgmr.msra.gmra.mrb[16].mxu0 %v4749_v27  ;;  %v4143_v27 = vld [vmem:[%s5931_s3 + $0x88] sm:$0xff]  }
 0x164   :  { %3609 = vmatpush3.bf16.msra.mxu1 %v4139_v41  ;;  %3617 = vmatpush3.bf16.msra.mxu0 %v4140_v30  ;;  %v4146_v41 = vld [vmem:[%s5931_s3 + $0xd8] sm:$0xff]  }
 0x165   :  { %3638 = vmatprep.subr.bf16.mxu1 %v4141_v18  ;;  %3618 = vmatprep.subr.bf16.mxu0 %v4142_v3  ;;  %v4147_v30 = vld [vmem:[%s5931_s3 + $0x98] sm:$0xff]   ;;  %v4148_v18 = vld [vmem:[%s5931_s3 + $0xe0] sm:$0xff]  }
 0x166   :  { %v4149_v3 = vld [vmem:[%s5931_s3 + $0xa0] sm:$0xff]  }
 0x168   :  { %3619 = vmatpush3.bf16.msra.mxu0 %v4143_v27  ;;  %v4150_v27 = vld [vmem:[%s5931_s3 + $0xe8] sm:$0xff]  }
 0x169   :  { %3620 = vmatprep.subr.bf16.mxu0 %v4144_v48  ;;  %v4151_v48 = vld [vmem:[%s5931_s3 + $0xa8] sm:$0xff]  }
 0x16c   :  { %3621 = vmatpush3.bf16.msra.mxu0 %v4145_v4  ;;  %v4152_v4 = vld [vmem:[%s5931_s3 + $0xf0] sm:$0xff]  }
 0x16d   :  { %3622 = vmatprep.subr.bf16.mxu0 %v4146_v41  ;;  %v4153_v41 = vld [vmem:[%s5931_s3 + $0xb0] sm:$0xff]  }
 0x170   :  { %3623 = vmatpush3.bf16.msra.mxu0 %v4147_v30  ;;  %v4154_v30 = vld [vmem:[%s5931_s3 + $0xf8] sm:$0xff]  }
 0x171   :  { %3624 = vmatprep.subr.bf16.mxu0 %v4148_v18  ;;  %v4155_v18 = vld [vmem:[%s5931_s3 + $0xb8] sm:$0xff]  }
 0x174   :  { %3625 = vmatpush3.bf16.msra.mxu0 %v4149_v3  ;;  %v4156_v3 = vld [vmem:[%s5931_s3 + $0x1c0] sm:$0xff]  }
 0x175   :  { %3626 = vmatprep.subr.bf16.mxu0 %v4150_v27  ;;  %v3280_v27 = vld [vmem:[%s5930_s2 + $0x3] ss:$8 sm:$0xf] }
 0x178   :  { %3627 = vmatpush3.bf16.msra.mxu0 %v4151_v48  ;;  %v3281_v48 = vld [vmem:[%s5930_s2 + $0x3] ss:$8 sm:$0xf0] }
 0x179   :  { %3628 = vmatprep.subr.bf16.mxu0 %v4152_v4  ;;  %v398_v4 = vld [vmem:[%s5930_s2] sm:$0xc0] }
 0x17a   :  { %v2121_v50 = vsub.f32 1.0, %v398_v4 }
 0x17c   :  { %3629 = vmatpush3.bf16.msra.mxu0 %v4153_v41  ;;  %v5113_v41 = vor.u32 %v3281_v48, %v3280_v27  ;;  %v2203_v22 = vmul.f32 %v2201_v42, %v2121_v50  ;;  %v390_v50 = vld [vmem:[%s5930_s2] sm:$0xc0] }
 0x17d   :  { %3630 = vmatprep.subr.bf16.mxu0 %v4154_v30  ;;  %v1151_v30 = vsub.s32 0, %v4360_v37 }
 0x17f   :  { %v5124_v17 = vrot.slane %v5113_v41, %v1151_v30 }
 0x180   :  { %3631 = vmatpush3.bf16.msra.mxu0 %v4155_v18  ;;  %v382_v18 = vld [vmem:[%s5930_s2 + $0x1] ss:$0 sm:$0xff] }
 0x181   :  { %3660 = vmatprep.subr.bf16.mxu0 %v4156_v3  ;;  %v1155_v3 = vsub.s32 1, %v4360_v37  ;;  %6057 = vst [vmem:[#allocation58_spill] sm:$0xff] %v5124_v17 }
 0x183   :  { %v5127_v48 = vrot.slane %v5113_v41, %v1155_v3 }
 0x185   :  { %6058 = vst [vmem:[#allocation59_spill] sm:$0xff] %v5127_v48 }
 0x1f6   :  { %v1081_v46 = vpop.f32.mrb[8].mxu0 }
 0x1f7   :  { %v5121_v25 = vadd.f32 %v1081_v46, %v382_v18  ;;  %v3878_v8 = vpop.f32.mrb[9].mxu0 }
 0x1f8   :  { %v1084_v27 = vpop.f32.mrb[10].mxu0 }
 0x1f9   :  { %v2197_v9 = vrot.slane %v5121_v25, 2  ;;  %2270 = vst.msk [vmem:[#allocation3] sm:$0x3] %vm2269_vm4, %v5121_v25  ;;  %v3879_v20 = vpop.f32.mrb[11].mxu0 }
 0x1fa   :  { %v1543_v51 = vpop.f32.mrb[12].mxu1  ;;  %v391_v20 = vld [vmem:[%s5930_s2 + $0x8] sm:$0xc0] }
 0x1fb   :  { %v2199_v33 = vmul.f32 %v2197_v9, %v398_v4  ;;  %v1544_v46 = vadd.f32 %v1543_v51, %v5124_v17  ;;  %v1545_v18 = vpop.f32.mrb[13].mxu1  ;;  %v2130_v51 = vcombine.low %v4375_v44, %v4375_v44  ;;  %v2113_v9 = vsub.f32 1.0, %v390_v50 }
 0x1fc   :  { %v1546_v8 = vadd.f32 %v1545_v18, %v5127_v48  ;;  %v1547_v30 = vpop.f32.mrb[14].mxu1  ;;  %v2114_v4 = vsub.f32 1.0, %v391_v20 }
 0x1fd   :  { %v2204_v27 = vadd.f32 %v2203_v22, %v2199_v33  ;;  %4089 = vtanh.f32 %v1544_v46  ;;  %v1548_v3 = vpop.f32.mrb[15].mxu1  ;;  %v2148_v22 = vmul.f32 %v2130_v51, %v390_v50  ;;  %v2149_v30 = vmul.f32 %v4375_v44, %v391_v20  ;;  %v4157_v50 = vld [vmem:[%s5931_s3 + $0x100] sm:$0xff]   ;;  %v4158_v44 = vld [vmem:[%s5931_s3 + $0x148] sm:$0xff]  }
 0x1fe   :  { %4091 = vtanh.f32 %v1546_v8 }
 0x1ff   :  { %2273 = vst.msk [vmem:[#allocation3 - $0x2] sm:$0xc0] %vm2272_vm5, %v2204_v27 }
 0x207   :  { %v4090_v42 = vpop.eup %4089 }
 0x208   :  { %v4092_v18 = vpop.eup %4091  ;;  %v2164_v33 = vrot.slane %v4090_v42, 2  ;;  %v2213_v46 = vrot.slane %v4090_v42, 6  ;;  %v1681_v8 = vpack.c.bf16 %v4090_v42, %v4090_v42 }
 0x209   :  { %v2165_v27 = vrot.slane %v4092_v18, 2  ;;  %v2214_v3 = vrot.slane %v4092_v18, 6  ;;  %v1682_v48 = vpack.c.bf16 %v4092_v18, %v4092_v18  ;;  %v4161_v18 = vld [vmem:[%s5931_s3 + $0x110] sm:$0xff]  }
 0x20a   :  { %v2180_v17 = vmul.f32 %v2164_v33, %v2113_v9  ;;  %2229 = vst [vmem:[#allocation2] sm:$0xc] %v2213_v46  ;;  %v1159_v9 = vsub.s32 2, %v4360_v37  ;;  %v4162_v33 = vld [vmem:[%s5931_s3 + $0x158] sm:$0xff]  }
 0x20b   :  { %v2181_v13 = vmul.f32 %v2165_v27, %v2114_v4  ;;  %2230 = vst [vmem:[#allocation2 + $0x8] sm:$0xc] %v2214_v3  ;;  %1721 = vmatprep.mubr.bf16.mxu1 %v1682_v48  ;;  %v1163_v48 = vsub.s32 3, %v4360_v37  ;;  %v1171_v4 = vsub.s32 5, %v4360_v37 }
 0x20c   :  { %v2188_v15 = vadd.f32 %v2180_v17, %v2148_v22  ;;  %1722 = vmatmul.mubr.bf16.vlgmr.msra.gmra.mrb[20].mxu1 %v1681_v8  ;;  %v5158_v17 = vrot.slane %v5113_v41, %v1159_v9  ;;  %v4164_v9 = vld [vmem:[%s5931_s3 + $0x160] sm:$0xff]  }
 0x20d   :  { %v2189_v31 = vadd.f32 %v2181_v13, %v2149_v30  ;;  %3639 = vmatpush3.bf16.msra.mxu1 %v4157_v50  ;;  %v4159_v13 = vld [vmem:[%s5931_s3 + $0x108] sm:$0xff]   ;;  %v5162_v42 = vrot.slane %v5113_v41, %v1163_v48  ;;  %v5177_v50 = vrot.slane %v5113_v41, %v1171_v4 }
 0x20e   :  { %v2245_v51 = vrot.slane %v2188_v15, 2  ;;  %3640 = vmatprep.subr.bf16.mxu1 %v4158_v44  ;;  %v4160_v15 = vld [vmem:[%s5931_s3 + $0x150] sm:$0xff]   ;;  %6059 = vst [vmem:[#allocation60_spill] sm:$0xff] %v5158_v17 }
 0x20f   :  { %v2246_v20 = vrot.slane %v2189_v31, 2  ;;  %v1167_v31 = vsub.s32 4, %v4360_v37  ;;  %6060 = vst [vmem:[#allocation61_spill] sm:$0xff] %v5162_v42  ;;  %6062 = vst [vmem:[#allocation63_spill] sm:$0xff] %v5177_v50 }
 0x210   :  { %2261 = vst [vmem:[#allocation2] sm:$0x30] %v2245_v51  ;;  %v4163_v51 = vld [vmem:[%s5931_s3 + $0x118] sm:$0xff]  }
 0x211   :  { %2262 = vst [vmem:[#allocation2 + $0x8] sm:$0x30] %v2246_v20  ;;  %3641 = vmatpush3.bf16.msra.mxu1 %v4159_v13  ;;  %v5173_v30 = vrot.slane %v5113_v41, %v1167_v31 }
 0x212   :  { %3642 = vmatprep.subr.bf16.mxu1 %v4160_v15 }
 0x213   :  { %6061 = vst [vmem:[#allocation62_spill] sm:$0xff] %v5173_v30 }
 0x215   :  { %3643 = vmatpush3.bf16.msra.mxu1 %v4161_v18  ;;  %v4165_v18 = vld [vmem:[%s5931_s3 + $0x120] sm:$0xff]  }
 0x216   :  { %v1584_v22 = vpop.f32.mrb[12].mxu0  ;;  %3644 = vmatprep.subr.bf16.mxu1 %v4162_v33  ;;  %v392_v33 = vld [vmem:[%s5930_s2 + $0x10] sm:$0xc0] }
 0x217   :  { %v1585_v46 = vadd.f32 %v1584_v22, %v5158_v17  ;;  %v1586_v8 = vpop.f32.mrb[13].mxu0  ;;  %v4166_v22 = vld [vmem:[%s5931_s3 + $0x168] sm:$0xff]  }
 0x218   :  { %v1587_v27 = vadd.f32 %v1586_v8, %v5162_v42  ;;  %v1588_v3 = vpop.f32.mrb[14].mxu0  ;;  %v2131_v8 = vcombine.low %v4372_v43, %v4372_v43 }
 0x219   :  { %4093 = vtanh.f32 %v1585_v46  ;;  %3645 = vmatpush3.bf16.msra.mxu1 %v4163_v51  ;;  %v1589_v44 = vpop.f32.mrb[15].mxu0  ;;  %v393_v46 = vld [vmem:[%s5930_s2 + $0x18] sm:$0xc0]  ;;  %v2115_v3 = vsub.f32 1.0, %v392_v33  ;;  %v4168_v51 = vld [vmem:[%s5931_s3 + $0x170] sm:$0xff]  }
 0x21a   :  { %4095 = vtanh.f32 %v1587_v27  ;;  %v1625_v20 = vpop.f32.mrb[16].mxu1  ;;  %3646 = vmatprep.subr.bf16.mxu1 %v4164_v9  ;;  %v4167_v27 = vld [vmem:[%s5931_s3 + $0x128] sm:$0xff]   ;;  %v2116_v9 = vsub.f32 1.0, %v393_v46 }
 0x21b   :  { %v1626_v48 = vadd.f32 %v1625_v20, %v5173_v30  ;;  %v1627_v13 = vpop.f32.mrb[17].mxu1  ;;  %v2140_v20 = vcombine.low %v4493_v21, %v4493_v21 }
 0x21c   :  { %v1628_v15 = vadd.f32 %v1627_v13, %v5177_v50  ;;  %v1629_v31 = vpop.f32.mrb[18].mxu1  ;;  %v4169_v50 = vld [vmem:[%s5931_s3 + $0x130] sm:$0xff]  }
 0x21d   :  { %4097 = vtanh.f32 %v1626_v48  ;;  %v1630_v4 = vpop.f32.mrb[19].mxu1  ;;  %3647 = vmatpush3.bf16.msra.mxu1 %v4165_v18  ;;  %v394_v48 = vld [vmem:[%s5930_s2 + $0x20] sm:$0xc0]  ;;  %v395_v18 = vld [vmem:[%s5930_s2 + $0x28] sm:$0xc0] }
 0x21e   :  { %4099 = vtanh.f32 %v1628_v15  ;;  %3648 = vmatprep.subr.bf16.mxu1 %v4166_v22  ;;  %v2150_v15 = vmul.f32 %v2131_v8, %v392_v33  ;;  %v2151_v22 = vmul.f32 %v4372_v43, %v393_v46  ;;  %v2117_v17 = vsub.f32 1.0, %v394_v48  ;;  %v4170_v33 = vld [vmem:[%s5931_s3 + $0x178] sm:$0xff]  }
 0x21f   :  { %v2152_v46 = vmul.f32 %v2140_v20, %v394_v48  ;;  %v2118_v43 = vsub.f32 1.0, %v395_v18  ;;  %v4172_v20 = vld [vmem:[%s5931_s3 + $0x180] sm:$0xff]  }
 0x221   :  { %3649 = vmatpush3.bf16.msra.mxu1 %v4167_v27 }
 0x222   :  { %3650 = vmatprep.subr.bf16.mxu1 %v4168_v51 }
 0x223   :  { %v4094_v44 = vpop.eup %4093 }
 0x224   :  { %v4096_v13 = vpop.eup %4095  ;;  %v2166_v31 = vrot.slane %v4094_v44, 2  ;;  %v2215_v4 = vrot.slane %v4094_v44, 6  ;;  %v1683_v8 = vpack.c.bf16 %v4094_v44, %v4094_v44  ;;  %v4171_v44 = vld [vmem:[%s5931_s3 + $0x138] sm:$0xff]  }
 0x225   :  { %v2167_v27 = vrot.slane %v4096_v13, 2  ;;  %v2216_v51 = vrot.slane %v4096_v13, 6  ;;  %3651 = vmatpush3.bf16.msra.mxu1 %v4169_v50  ;;  %v1684_v30 = vpack.c.bf16 %v4096_v13, %v4096_v13 }
 0x226   :  { %v2182_v42 = vmul.f32 %v2166_v31, %v2115_v3  ;;  %2231 = vst [vmem:[#allocation2 + $0x10] sm:$0xc] %v2215_v4  ;;  %3652 = vmatprep.subr.bf16.mxu1 %v4170_v33  ;;  %v2153_v3 = vmul.f32 %v4493_v21, %v395_v18  ;;  %v4173_v21 = vld [vmem:[%s5931_s3 + $0x1c8] sm:$0xff]  }
 0x227   :  { %v4098_v60 = vpop.eup %4097  ;;  %v2183_v55 = vmul.f32 %v2167_v27, %v2116_v9  ;;  %2232 = vst [vmem:[#allocation2 + $0x18] sm:$0xc] %v2216_v51  ;;  %1761 = vmatprep.mubr.bf16.mxu0 %v1684_v30  ;;  %v1179_v27 = vsub.s32 7, %v4360_v37  ;;  %v4177_v51 = vld [vmem:[%s5931_s3 + $0x1d8] sm:$0xff]  }
 0x228   :  { %v4100_v56 = vpop.eup %4099  ;;  %v2190_v32 = vadd.f32 %v2182_v42, %v2150_v15  ;;  %v2168_v38 = vrot.slane %v4098_v60, 2  ;;  %v2217_v50 = vrot.slane %v4098_v60, 6  ;;  %1762 = vmatmul.mubr.bf16.vlgmr.msra.gmra.mrb[20].mxu0 %v1683_v8  ;;  %v1685_v48 = vpack.c.bf16 %v4098_v60, %v4098_v60  ;;  %v4175_v60 = vld [vmem:[%s5931_s3 + $0x1d0] sm:$0xff]  }
 0x229   :  { %v2191_v13 = vadd.f32 %v2183_v55, %v2151_v22  ;;  %v2169_v31 = vrot.slane %v4100_v56, 2  ;;  %v2218_v4 = vrot.slane %v4100_v56, 6  ;;  %3653 = vmatpush3.bf16.msra.mxu1 %v4171_v44  ;;  %3661 = vmatpush3.bf16.msra.mxu0 %v4172_v20  ;;  %v1686_v30 = vpack.c.bf16 %v4100_v56, %v4100_v56  ;;  %v4181_v44 = vld [vmem:[%s5931_s3 + $0x1e8] sm:$0xff]  }
 0x22a   :  { %v2247_v42 = vrot.slane %v2190_v32, 2  ;;  %v2184_v9 = vmul.f32 %v2168_v38, %v2117_v17  ;;  %2233 = vst [vmem:[#allocation2 + $0x20] sm:$0xc] %v2217_v50  ;;  %3662 = vmatprep.subr.bf16.mxu0 %v4173_v21  ;;  %v6063_v55 = vmov 0.0   ;;  %v4174_v32 = vld [vmem:[%s5931_s3 + $0x188] sm:$0xff]   ;;  %v1175_v17 = vsub.s32 6, %v4360_v37 }
 0x22b   :  { %3888 = vmatprep.subr.bf16.mxu1 %v6063_v55  ;;  %v2248_v15 = vrot.slane %v2191_v13, 2  ;;  %v2185_v18 = vmul.f32 %v2169_v31, %v2118_v43  ;;  %2234 = vst [vmem:[#allocation2 + $0x28] sm:$0xc] %v2218_v4  ;;  %1801 = vmatprep.mubr.bf16.mxu1 %v1686_v30  ;;  %v5257_v8 = vrot.slane %v5113_v41, %v1179_v27  ;;  %v4179_v50 = vld [vmem:[%s5931_s3 + $0x1e0] sm:$0xff]   ;;  %v4182_v20 = vld [vmem:[%s5931_s3 + $0x1a8] sm:$0xff]   ;;  %v4183_v30 = vld [vmem:[%s5931_s3 + $0x1f0] sm:$0xff]  }
 0x22c   :  { %2263 = vst [vmem:[#allocation2 + $0x10] sm:$0x30] %v2247_v42  ;;  %v2192_v22 = vadd.f32 %v2184_v9, %v2152_v46  ;;  %1802 = vmatmul.mubr.bf16.vlgmr.msra.gmra.mrb[24].mxu1 %v1685_v48  ;;  %v5254_v33 = vrot.slane %v5113_v41, %v1175_v17  ;;  %v4178_v46 = vld [vmem:[%s5931_s3 + $0x198] sm:$0xff]   ;;  %v2141_v42 = vcombine.low %v4477_v14, %v4477_v14  ;;  %v5752_v37 = vld [vmem:[%s5935_s7 + $0x160] sm:$0xff]  }
 0x22d   :  { %2264 = vst [vmem:[#allocation2 + $0x18] sm:$0x30] %v2248_v15  ;;  %v2193_v56 = vadd.f32 %v2185_v18, %v2153_v3  ;;  %3663 = vmatpush3.bf16.msra.mxu0 %v4174_v32  ;;  %3889 = vmatpush3.bf16.msra.mxu1 %v4542_v35  ;;  %v4176_v35 = vld [vmem:[%s5931_s3 + $0x190] sm:$0xff]   ;;  %v397_v9 = vld [vmem:[%s5930_s2 + $0x38] sm:$0xc0] }
 0x22e   :  { %v2249_v38 = vrot.slane %v2192_v22, 2  ;;  %3664 = vmatprep.subr.bf16.mxu0 %v4175_v60  ;;  %3890 = vmatprep.subr.bf16.mxu1 %v6063_v55  ;;  %v4185_v21 = vld [vmem:[%s5931_s3 + $0x1f8] sm:$0xff]   ;;  %v2120_v18 = vsub.f32 1.0, %v397_v9  ;;  %v2155_v60 = vmul.f32 %v4477_v14, %v397_v9 }
 0x22f   :  { %v2250_v43 = vrot.slane %v2193_v56, 2  ;;  %3904 = vmatprep.mubr.msk.bf16.mxu1 %vm4206_vm1, %v6063_v55 }
 0x230   :  { %2265 = vst [vmem:[#allocation2 + $0x20] sm:$0x30] %v2249_v38 }
 0x231   :  { %2266 = vst [vmem:[#allocation2 + $0x28] sm:$0x30] %v2250_v43  ;;  %3665 = vmatpush3.bf16.msra.mxu0 %v4176_v35  ;;  %3891 = vmatpush3.bf16.msra.mxu1 %v4564_v47 }
 0x232   :  { %3666 = vmatprep.subr.bf16.mxu0 %v4177_v51  ;;  %3892 = vmatprep.subr.bf16.mxu1 %v6063_v55 }
 0x235   :  { %3667 = vmatpush3.bf16.msra.mxu0 %v4178_v46  ;;  %3893 = vmatpush3.bf16.msra.mxu1 %v4586_v54  ;;  %v4180_v54 = vld [vmem:[%s5931_s3 + $0x1a0] sm:$0xff]  }
 0x236   :  { %v1666_v47 = vpop.f32.mrb[16].mxu0  ;;  %3668 = vmatprep.subr.bf16.mxu0 %v4179_v50  ;;  %3894 = vmatprep.subr.bf16.mxu1 %v6063_v55 }
 0x237   :  { %v1667_v3 = vadd.f32 %v1666_v47, %v5254_v33  ;;  %v1668_v13 = vpop.f32.mrb[17].mxu0 }
 0x238   :  { %v1669_v41 = vadd.f32 %v1668_v13, %v5257_v8  ;;  %v1670_v31 = vpop.f32.mrb[18].mxu0 }
 0x239   :  { %4101 = vtanh.f32 %v1667_v3  ;;  %v1671_v4 = vpop.f32.mrb[19].mxu0  ;;  %3669 = vmatpush3.bf16.msra.mxu0 %v4180_v54  ;;  %3895 = vmatpush3.bf16.msra.mxu1 %v4605_v59  ;;  %v396_v59 = vld [vmem:[%s5930_s2 + $0x30] sm:$0xc0]  ;;  %v4187_v3 = vld [vmem:[%s5933_s5] sm:$0xff]   ;;  %v1893_v31 = vpack.c.bf16 %v5121_v25, %v5121_v25 }
 0x23a   :  { %4103 = vtanh.f32 %v1669_v41  ;;  %3670 = vmatprep.subr.bf16.mxu0 %v4181_v44  ;;  %3896 = vmatprep.subr.bf16.mxu1 %v6063_v55  ;;  %v2119_v48 = vsub.f32 1.0, %v396_v59  ;;  %v2154_v56 = vmul.f32 %v2141_v42, %v396_v59  ;;  %v4188_v41 = vld [vmem:[%s5933_s5 + $0x8] sm:$0xff]  }
 0x23d   :  { %3671 = vmatpush3.bf16.msra.mxu0 %v4182_v20  ;;  %3897 = vmatpush3.bf16.msra.mxu1 %v4624_v0  ;;  %v4184_v0 = vld [vmem:[%s5931_s3 + $0x1b0] sm:$0xff]  }
 0x23e   :  { %3672 = vmatprep.subr.bf16.mxu0 %v4183_v30  ;;  %3898 = vmatprep.subr.bf16.mxu1 %v6063_v55 }
 0x241   :  { %3673 = vmatpush3.bf16.msra.mxu0 %v4184_v0  ;;  %3899 = vmatpush3.bf16.msra.mxu1 %v4637_v2  ;;  %v4186_v2 = vld [vmem:[%s5931_s3 + $0x1b8] sm:$0xff]  }
 0x242   :  { %3674 = vmatprep.subr.bf16.mxu0 %v4185_v21  ;;  %3900 = vmatprep.subr.bf16.mxu1 %v6063_v55 }
 0x243   :  { %v4102_v15 = vpop.eup %4101 }
 0x244   :  { %v4104_v22 = vpop.eup %4103  ;;  %v2170_v32 = vrot.slane %v4102_v15, 2  ;;  %v2219_v38 = vrot.slane %v4102_v15, 6  ;;  %v1687_v51 = vpack.c.bf16 %v4102_v15, %v4102_v15 }
 0x245   :  { %v2171_v43 = vrot.slane %v4104_v22, 2  ;;  %v2220_v17 = vrot.slane %v4104_v22, 6  ;;  %3675 = vmatpush3.bf16.msra.mxu0 %v4186_v2  ;;  %v1688_v27 = vpack.c.bf16 %v4104_v22, %v4104_v22  ;;  %3901 = vmatpush3.bf16.msra.mxu1 %v4655_v7  ;;  %v6075_v2 = vld [vmem:[#allocation26_spill] sm:$0xff] }
 0x246   :  { %v2186_v35 = vmul.f32 %v2170_v32, %v2119_v48  ;;  %2235 = vst [vmem:[#allocation2 + $0x30] sm:$0xc] %v2219_v38  ;;  %3908 = vmatprep.subr.bf16.mxu0 %v6063_v55  ;;  %3902 = vmatprep.subr.bf16.mxu1 %v6063_v55  ;;  %v6067_v32 = vld [vmem:[#allocation18_spill] sm:$0xff]  ;;  %v6068_v38 = vld [vmem:[#allocation21_spill] sm:$0xff] }
 0x247   :  { %v2187_v46 = vmul.f32 %v2171_v43, %v2120_v18  ;;  %2236 = vst [vmem:[#allocation2 + $0x38] sm:$0xc] %v2220_v17  ;;  %1841 = vmatprep.mubr.bf16.mxu0 %v1688_v27  ;;  %v6072_v43 = vld [vmem:[#allocation25_spill] sm:$0xff]  ;;  %v6074_v17 = vld [vmem:[#allocation27_spill] sm:$0xff] }
 0x248   :  { %v2194_v47 = vadd.f32 %v2186_v35, %v2154_v56  ;;  %1842 = vmatmul.mubr.bf16.vlgmr.msra.gmra.mrb[24].mxu0 %v1687_v51  ;;  %v6065_v56 = vld [vmem:[#allocation16_spill] sm:$0xff]  ;;  %v6076_v27 = vld [vmem:[#allocation29_spill] sm:$0xff]  ;;  %v6078_v51 = vld [vmem:[#allocation31_spill] sm:$0xff] }
 0x249   :  { %v2195_v50 = vadd.f32 %v2187_v46, %v2155_v60  ;;  %3909 = vmatpush3.bf16.msra.mxu0 %v4187_v3  ;;  %3912 = vmatprep.mubr.msk.bf16.mxu0 %vm4206_vm1, %v6063_v55  ;;  %v6070_v60 = vld [vmem:[#allocation23_spill] sm:$0xff]  ;;  %v6077_v35 = vld [vmem:[#allocation28_spill] sm:$0xff]  ;;  %v6079_v46 = vld [vmem:[#allocation30_spill] sm:$0xff] }
 0x24a   :  { %v2251_v7 = vrot.slane %v2194_v47, 2  ;;  %3910 = vmatprep.subr.bf16.mxu0 %v6063_v55  ;;  %3903 = vmatpush3.bf16.msra.mxu1 %v4674_v12  ;;  %v6080_v47 = vld [vmem:[#allocation33_spill] sm:$0xff]  ;;  %v6082_v3 = vld [vmem:[#allocation35_spill] sm:$0xff] }
 0x24b   :  { %v2252_v13 = vrot.slane %v2195_v50, 2  ;;  %1982 = vmatprep.subr.bf16.mxu1 %v4694_v23  ;;  %v6081_v50 = vld [vmem:[#allocation32_spill] sm:$0xff] }
 0x24c   :  { %2267 = vst [vmem:[#allocation2 + $0x30] sm:$0x30] %v2251_v7  ;;  %v6083_v7 = vld [vmem:[#allocation34_spill] sm:$0xff] }
 0x24d   :  { %2268 = vst [vmem:[#allocation2 + $0x38] sm:$0x30] %v2252_v13  ;;  %3911 = vmatpush3.bf16.msra.mxu0 %v4188_v41  ;;  %v6084_v13 = vld [vmem:[#allocation37_spill] sm:$0xff]  ;;  %v6085_v41 = vld [vmem:[#allocation36_spill] sm:$0xff] }
 0x24e   :  { %1941 = vmatprep.subr.bf16.mxu0 %v4552_v40 }
 0x250   :  { %3913 = vmatmul.mubr.msk.bf16.vlgmr.msra.gmra.mrb[28].mxu0 %vm1100_vm0, %v1893_v31  ;;  %v6086_v31 = vld [vmem:[#allocation39_spill] sm:$0xff] }
 0x251   :  { %1942 = vmatpush1.bf16.msra.mxu0 %v4550_v39  ;;  %1973 = vmatprep.mubr.bf16.mxu0 %v6045_v45 }
 0x252   :  { %1943 = vmatprep.subr.bf16.mxu0 %v4566_v49 }
 0x255   :  { %1944 = vmatpush1.bf16.msra.mxu0 %v4577_v52 }
 0x256   :  { %1945 = vmatprep.subr.bf16.mxu0 %v4580_v53 }
 0x259   :  { %1946 = vmatpush1.bf16.msra.mxu0 %v4596_v57 }
 0x25a   :  { %1947 = vmatprep.subr.bf16.mxu0 %v4599_v58 }
 0x25d   :  { %1948 = vmatpush1.bf16.msra.mxu0 %v4615_v62 }
 0x25e   :  { %1949 = vmatprep.subr.bf16.mxu0 %v4618_v63 }
 0x261   :  { %1950 = vmatpush1.bf16.msra.mxu0 %v4628_v1 }
 0x262   :  { %1951 = vmatprep.subr.bf16.mxu0 %v4646_v5 }
 0x265   :  { %1952 = vmatpush1.bf16.msra.mxu0 %v4648_v6 }
 0x266   :  { %1953 = vmatprep.subr.bf16.mxu0 %v4665_v10 }
 0x269   :  { %1954 = vmatpush1.bf16.msra.mxu0 %v4667_v11 }
 0x26a   :  { %1955 = vmatprep.subr.bf16.mxu0 %v4684_v16 }
 0x26d   :  { %1956 = vmatpush1.bf16.msra.mxu0 %v4692_v19 }
 0x26e   :  { %2023 = vmatprep.subr.bf16.mxu0 %v4707_v28 }
 0x2df   :  { %v3610_v39 = vpop.f32.mrb[20].mxu1 }
 0x2e0   :  { %v3611_v40 = vpop.f32.mrb[21].mxu1 }
 0x2e1   :  { %v3612_v49 = vadd.f32 %v3611_v40, %v3610_v39  ;;  %v3613_v52 = vpop.f32.mrb[22].mxu1  ;;  %v6087_v39 = vld [vmem:[#allocation38_spill] sm:$0xff]  ;;  %v6088_v40 = vld [vmem:[#allocation41_spill] sm:$0xff] }
 0x2e2   :  { %v3614_v53 = vpop.f32.mrb[23].mxu1  ;;  %v6090_v52 = vld [vmem:[#allocation43_spill] sm:$0xff] }
 0x2e3   :  { %v1724_v62 = vadd.f32 %v3612_v49, %v4716_v36  ;;  %v6089_v49 = vld [vmem:[#allocation40_spill] sm:$0xff]  ;;  %v6091_v53 = vld [vmem:[#allocation42_spill] sm:$0xff] }
 0x2fb   :  { %v3632_v57 = vpop.f32.mrb[20].mxu0 }
 0x2fc   :  { %v3633_v58 = vpop.f32.mrb[21].mxu0 }
 0x2fd   :  { %v3634_v63 = vadd.f32 %v3633_v58, %v3632_v57  ;;  %v3635_v1 = vpop.f32.mrb[22].mxu0  ;;  %v6092_v57 = vld [vmem:[#allocation44_spill] sm:$0xff]  ;;  %v5385_v58 = vld [vmem:[%s5936_s8] sm:$0xff]  }
 0x2fe   :  { %v3636_v5 = vpop.f32.mrb[23].mxu0  ;;  %v5403_v1 = vld [vmem:[%s5935_s7 + $0xc0] sm:$0xff]  }
 0x2ff   :  { %v1764_v6 = vadd.f32 %v3634_v63, %v1724_v62  ;;  %v3654_v10 = vpop.f32.mrb[24].mxu1  ;;  %v6094_v62 = vld [vmem:[#allocation45_spill] sm:$0xff]  ;;  %v6095_v63 = vld [vmem:[#allocation46_spill] sm:$0xff] }
 0x300   :  { %v3655_v11 = vpop.f32.mrb[25].mxu1  ;;  %v2290_v5 = vld [vmem:[#allocation3] sm:$0x3f] }
 0x301   :  { %v3656_v12 = vadd.f32 %v3655_v11, %v3654_v10  ;;  %v3657_v16 = vpop.f32.mrb[26].mxu1  ;;  %v2277_v10 = vld [vmem:[#allocation2 + $0x18] sm:$0x3f]  ;;  %v6098_v11 = vld [vmem:[#allocation48_spill] sm:$0xff] }
 0x302   :  { %v3658_v19 = vpop.f32.mrb[27].mxu1  ;;  %v2291_v16 = vpack.c.bf16 %v2290_v5, %v2290_v5  ;;  %v5630_v5 = vld [vmem:[%s5935_s7 + $0x30] sm:$0xff]  }
 0x303   :  { %v1804_v23 = vadd.f32 %v3656_v12, %v1764_v6  ;;  %v6097_v6 = vld [vmem:[#allocation47_spill] sm:$0xff]  ;;  %v5411_v12 = vld [vmem:[%s5935_s7 + $0x80] sm:$0xff]  }
 0x304   :  { %v5417_v19 = vld [vmem:[%s5935_s7 + $0xc8] sm:$0xff]  }
 0x31b   :  { %v3676_v28 = vpop.f32.mrb[24].mxu0 }
 0x31c   :  { %v3677_v25 = vpop.f32.mrb[25].mxu0 }
 0x31d   :  { %v3678_v4 = vadd.f32 %v3677_v25, %v3676_v28  ;;  %v3679_v54 = vpop.f32.mrb[26].mxu0  ;;  %v6099_v28 = vld [vmem:[#allocation49_spill] sm:$0xff]  ;;  %v5425_v25 = vld [vmem:[%s5935_s7 + $0x88] sm:$0xff]  }
 0x31e   :  { %v3680_v44 = vpop.f32.mrb[27].mxu0  ;;  %v5432_v54 = vld [vmem:[%s5935_s7 + $0xd0] sm:$0xff]  }
 0x31f   :  { %v1844_v20 = vadd.f32 %v3678_v4, %v1804_v23  ;;  %v2285_v23 = vpack.c.bf16 %v2277_v10, %v2277_v10  ;;  %v6100_v4 = vld [vmem:[#allocation50_spill] sm:$0xff]  ;;  %v6101_v44 = vld [vmem:[#allocation51_spill] sm:$0xff]  ;;  %v5642_v10 = vld [vmem:[%s5935_s7 + $0x78] sm:$0xff]  }
 0x321   :  { %vm1849_vm6 = vcmp.gt.f32.partialorder %v1844_v20, 0.0  ;;  %v1850_v30 = vmul.f32 0.2, %v1844_v20 }
 0x323   :  { %v1851_v59 = vsel %vm1849_vm6, %v1844_v20, %v1850_v30  ;;  %v1931_v36 = vpop.f32.mrb[28].mxu0  ;;  %v6102_v20 = vld [vmem:[#allocation52_spill] sm:$0xff] }
 0x324   :  { %v1852_v42 = vpack.c.bf16 %v1851_v59, %v1851_v59  ;;  %v1932_v9 = vadd.f32 %v1931_v36, %v4722_v34  ;;  %v3914_v0 = vpop.f32.mrb[29].mxu0  ;;  %v6064_v34 = vld [vmem:[#allocation17_spill] sm:$0xff]  ;;  %v5440_v30 = vld [vmem:[%s5935_s7 + $0x90] sm:$0xff]  }
 0x325   :  { %v1934_v48 = vpop.f32.mrb[30].mxu0  ;;  %6093 = vst [vmem:[#allocation17_spill] sm:$0xff] %v5385_v58  ;;  %v5446_v59 = vld [vmem:[%s5935_s7 + $0xd8] sm:$0xff]   ;;  %v5460_v0 = vld [vmem:[%s5935_s7 + $0xe0] sm:$0xff]  }
 0x326   :  { %vm1937_vm7 = vcmp.gt.f32.partialorder %v1932_v9, 0.0  ;;  %v1938_v21 = vmul.f32 0.2, %v1932_v9  ;;  %3905 = vmatmul.mubr.bf16.vlgmr.msra.gmra.mrb[28].mxu1 %v1852_v42  ;;  %v3915_v15 = vpop.f32.mrb[31].mxu0  ;;  %v6103_v36 = vld [vmem:[#allocation53_spill] sm:$0xff]  ;;  %v6104_v42 = vld [vmem:[#allocation54_spill] sm:$0xff] }
 0x327   :  { %1983 = vmatpush1.bf16.msra.mxu1 %v4697_v24  ;;  %2014 = vmatprep.mubr.bf16.mxu1 %v6045_v45  ;;  %v6066_v24 = vld [vmem:[#allocation19_spill] sm:$0xff]  ;;  %v5468_v15 = vld [vmem:[%s5935_s7 + $0xa0] sm:$0xff]  }
 0x328   :  { %v1939_v18 = vsel %vm1937_vm7, %v1932_v9, %v1938_v21  ;;  %1984 = vmatprep.subr.bf16.mxu1 %v4731_v61  ;;  %v6069_v61 = vld [vmem:[#allocation20_spill] sm:$0xff]  ;;  %v5454_v9 = vld [vmem:[%s5935_s7 + $0x98] sm:$0xff]   ;;  %v6105_v48 = vld [vmem:[#allocation55_spill] sm:$0xff] }
 0x329   :  { %v5345_v22 = vpack.c.bf16 %v1939_v18, %v1939_v18  ;;  %v6106_v21 = vld [vmem:[#allocation56_spill] sm:$0xff]  ;;  %v5473_v18 = vld [vmem:[%s5935_s7 + $0x40] sm:$0xff]  }
 0x32b   :  { %1985 = vmatpush1.bf16.msra.mxu1 %v4746_v26  ;;  %1974 = vmatmul.mubr.bf16.vlgmr.msra.gmra.mrb[32].mxu0 %v5345_v22  ;;  %v6071_v26 = vld [vmem:[#allocation22_spill] sm:$0xff] }
 0x32c   :  { %2024 = vmatpush1.bf16.msra.mxu0 %v4709_v29  ;;  %1986 = vmatprep.subr.bf16.mxu1 %v6064_v34  ;;  %v6073_v29 = vld [vmem:[#allocation24_spill] sm:$0xff]  ;;  %v5479_v34 = vld [vmem:[%s5935_s7 + $0xe8] sm:$0xff]  }
 0x32d   :  { %2025 = vmatprep.subr.bf16.mxu0 %v6065_v56  ;;  %2055 = vmatprep.mubr.bf16.mxu0 %v6045_v45  ;;  %v2275_v56 = vld [vmem:[#allocation2 + $0x8] sm:$0x3f] }
 0x32f   :  { %1987 = vmatpush1.bf16.msra.mxu1 %v6066_v24  ;;  %v6107_v24 = vld [vmem:[#allocation57_spill] sm:$0xff] }
 0x330   :  { %2026 = vmatpush1.bf16.msra.mxu0 %v6067_v32  ;;  %1988 = vmatprep.subr.bf16.mxu1 %v6068_v38  ;;  %v5485_v32 = vld [vmem:[%s5935_s7] sm:$0xff]   ;;  %v5492_v38 = vld [vmem:[%s5935_s7 + $0xa8] sm:$0xff]  }
 0x331   :  { %2027 = vmatprep.subr.bf16.mxu0 %v6069_v61  ;;  %v5497_v61 = vld [vmem:[%s5935_s7 + $0x48] sm:$0xff]  }
 0x333   :  { %1989 = vmatpush1.bf16.msra.mxu1 %v6070_v60  ;;  %v2283_v60 = vpack.c.bf16 %v2275_v56, %v2275_v56 }
 0x334   :  { %2028 = vmatpush1.bf16.msra.mxu0 %v6071_v26  ;;  %1990 = vmatprep.subr.bf16.mxu1 %v6072_v43  ;;  %v5503_v26 = vld [vmem:[%s5935_s7 + $0xf0] sm:$0xff]   ;;  %v5510_v43 = vld [vmem:[%s5935_s7 + $0x8] sm:$0xff]  }
 0x335   :  { %2029 = vmatprep.subr.bf16.mxu0 %v6073_v29  ;;  %v5517_v29 = vld [vmem:[%s5935_s7 + $0xb0] sm:$0xff]  }
 0x337   :  { %1991 = vmatpush1.bf16.msra.mxu1 %v6074_v17  ;;  %v5528_v17 = vld [vmem:[%s5935_s7 + $0xf8] sm:$0xff]  }
 0x338   :  { %2030 = vmatpush1.bf16.msra.mxu0 %v6075_v2  ;;  %1992 = vmatprep.subr.bf16.mxu1 %v6076_v27  ;;  %v5534_v2 = vld [vmem:[%s5935_s7 + $0x10] sm:$0xff]   ;;  %v5541_v27 = vld [vmem:[%s5935_s7 + $0xb8] sm:$0xff]  }
 0x339   :  { %2031 = vmatprep.subr.bf16.mxu0 %v6077_v35  ;;  %v5546_v35 = vld [vmem:[%s5935_s7 + $0x58] sm:$0xff]  }
 0x33b   :  { %1993 = vmatpush1.bf16.msra.mxu1 %v6078_v51  ;;  %v5552_v51 = vld [vmem:[%s5935_s7 + $0x1c0] sm:$0xff]  }
 0x33c   :  { %2032 = vmatpush1.bf16.msra.mxu0 %v6079_v46  ;;  %1994 = vmatprep.subr.bf16.mxu1 %v6080_v47  ;;  %v2276_v46 = vld [vmem:[#allocation2 + $0x10] sm:$0x3f]  ;;  %v5558_v47 = vld [vmem:[%s5935_s7 + $0x18] sm:$0xff]  }
 0x33d   :  { %2033 = vmatprep.subr.bf16.mxu0 %v6081_v50  ;;  %v2281_v50 = vld [vmem:[#allocation2 + $0x38] sm:$0x3f] }
 0x33f   :  { %1995 = vmatpush1.bf16.msra.mxu1 %v6082_v3  ;;  %v5565_v3 = vld [vmem:[%s5935_s7 + $0x180] sm:$0xff]  }
 0x340   :  { %2034 = vmatpush1.bf16.msra.mxu0 %v6083_v7  ;;  %1996 = vmatprep.subr.bf16.mxu1 %v6084_v13  ;;  %v2284_v7 = vpack.c.bf16 %v2276_v46, %v2276_v46  ;;  %v5571_v13 = vld [vmem:[%s5935_s7 + $0x60] sm:$0xff]   ;;  %v5709_v46 = vld [vmem:[%s5935_s7 + $0x1b0] sm:$0xff]  }
 0x341   :  { %2035 = vmatprep.subr.bf16.mxu0 %v6085_v41  ;;  %v5576_v41 = vld [vmem:[%s5935_s7 + $0x1c8] sm:$0xff]  }
 0x343   :  { %1997 = vmatpush1.bf16.msra.mxu1 %v6086_v31  ;;  %v2289_v31 = vpack.c.bf16 %v2281_v50, %v2281_v50  ;;  %v5714_v50 = vld [vmem:[%s5935_s7 + $0x150] sm:$0xff]  }
 0x344   :  { %2036 = vmatpush1.bf16.msra.mxu0 %v6087_v39  ;;  %2064 = vmatprep.subr.bf16.mxu1 %v6088_v40  ;;  %v5582_v39 = vld [vmem:[%s5935_s7 + $0x20] sm:$0xff]   ;;  %v5588_v40 = vld [vmem:[%s5935_s7 + $0x188] sm:$0xff]  }
 0x345   :  { %2037 = vmatprep.subr.bf16.mxu0 %v6089_v49  ;;  %v5593_v49 = vld [vmem:[%s5935_s7 + $0x68] sm:$0xff]  }
 0x346   :  { %2015 = vmatmul.mubr.bf16.vlgmr.msra.gmra.mrb[32].mxu1 %v5345_v22 }
 0x347   :  { %2065 = vmatpush1.bf16.msra.mxu1 %v6090_v52  ;;  %2096 = vmatprep.mubr.bf16.mxu1 %v6045_v45  ;;  %v5395_v45 = vld [vmem:[%s5936_s8 + $0x8] sm:$0xff]   ;;  %v5600_v52 = vld [vmem:[%s5935_s7 + $0x1d0] sm:$0xff]  }
 0x348   :  { %2038 = vmatpush1.bf16.msra.mxu0 %v6091_v53  ;;  %2066 = vmatprep.subr.bf16.mxu1 %v6092_v57  ;;  %6096 = vst [vmem:[#allocation16_spill] sm:$0xff] %v5395_v45  ;;  %v5606_v53 = vld [vmem:[%s5935_s7 + $0x28] sm:$0xff]   ;;  %v5613_v57 = vld [vmem:[%s5935_s7 + $0x190] sm:$0xff]  }
 0x349   :  { %3916 = vmatprep.subr.bf16.mxu0 %v6063_v55 }
 0x34b   :  { %2056 = vmatmul.mubr.bf16.vlgmr.msra.gmra.mrb[36].mxu0 %v5345_v22  ;;  %2067 = vmatpush1.bf16.msra.mxu1 %v6094_v62  ;;  %v5618_v62 = vld [vmem:[%s5935_s7 + $0x70] sm:$0xff]  }
 0x34c   :  { %3917 = vmatpush3.bf16.msra.mxu0 %v5385_v58  ;;  %2068 = vmatprep.subr.bf16.mxu1 %v6095_v63  ;;  %v5624_v63 = vld [vmem:[%s5935_s7 + $0x1d8] sm:$0xff]   ;;  %v5759_v58 = vld [vmem:[%s5935_s7 + $0x120] sm:$0xff]  }
 0x34d   :  { %3918 = vmatprep.subr.bf16.mxu0 %v6063_v55  ;;  %3920 = vmatprep.mubr.msk.bf16.mxu0 %vm4206_vm1, %v6063_v55  ;;  %v5765_v55 = vld [vmem:[%s5935_s7 + $0x168] sm:$0xff]  }
 0x34f   :  { %2069 = vmatpush1.bf16.msra.mxu1 %v6097_v6  ;;  %v5637_v6 = vld [vmem:[%s5935_s7 + $0x198] sm:$0xff]  }
 0x350   :  { %3919 = vmatpush3.bf16.msra.mxu0 %v5395_v45  ;;  %2070 = vmatprep.subr.bf16.mxu1 %v6098_v11  ;;  %v5648_v11 = vld [vmem:[%s5935_s7 + $0x1e0] sm:$0xff]  }
 0x351   :  { %3719 = vmatprep.subr.bf16.mxu0 %v5403_v1 }
 0x353   :  { %2071 = vmatpush1.bf16.msra.mxu1 %v6099_v28  ;;  %3921 = vmatmul.mubr.msk.bf16.vlgmr.msra.gmra.mrb[40].mxu0 %vm1100_vm0, %v2291_v16  ;;  %v5654_v16 = vld [vmem:[%s5935_s7 + $0x38] sm:$0xff]   ;;  %v5666_v28 = vld [vmem:[%s5935_s7 + $0x140] sm:$0xff]  }
 0x354   :  { %3720 = vmatpush3.bf16.msra.mxu0 %v5411_v12  ;;  %2803 = vmatprep.mubr.bf16.mxu0 %v2285_v23  ;;  %v5661_v23 = vld [vmem:[%s5935_s7 + $0x1a0] sm:$0xff]  }
 0x355   :  { %2072 = vmatprep.subr.bf16.mxu1 %v6100_v4  ;;  %3721 = vmatprep.subr.bf16.mxu0 %v5417_v19  ;;  %v2274_v4 = vld [vmem:[#allocation2] sm:$0x3f] }
 0x357   :  { %2073 = vmatpush1.bf16.msra.mxu1 %v6101_v44  ;;  %v5672_v44 = vld [vmem:[%s5935_s7 + $0x1e8] sm:$0xff]  }
 0x358   :  { %3722 = vmatpush3.bf16.msra.mxu0 %v5425_v25  ;;  %2074 = vmatprep.subr.bf16.mxu1 %v6102_v20  ;;  %v2279_v20 = vld [vmem:[#allocation2 + $0x28] sm:$0x3f] }
 0x359   :  { %3723 = vmatprep.subr.bf16.mxu0 %v5432_v54  ;;  %v2287_v56 = vpack.c.bf16 %v2279_v20, %v2279_v20  ;;  %v5738_v20 = vld [vmem:[%s5935_s7 + $0x158] sm:$0xff]  }
 0x35b   :  { %2075 = vmatpush1.bf16.msra.mxu1 %v6103_v36  ;;  %v5678_v36 = vld [vmem:[%s5935_s7 + $0x100] sm:$0xff]  }
 0x35c   :  { %3724 = vmatpush3.bf16.msra.mxu0 %v5440_v30  ;;  %2076 = vmatprep.subr.bf16.mxu1 %v6104_v42  ;;  %v2282_v42 = vpack.c.bf16 %v2274_v4, %v2274_v4  ;;  %v5733_v4 = vld [vmem:[%s5935_s7 + $0x1b8] sm:$0xff]  }
 0x35d   :  { %3725 = vmatprep.subr.bf16.mxu0 %v5446_v59  ;;  %6109 = vst [vmem:[#allocation18_spill] sm:$0xff] %v5733_v4 }
 0x35f   :  { %2077 = vmatpush1.bf16.msra.mxu1 %v6105_v48  ;;  %v5685_v48 = vld [vmem:[%s5935_s7 + $0x1a8] sm:$0xff]  }
 0x360   :  { %3726 = vmatpush3.bf16.msra.mxu0 %v5454_v9  ;;  %2078 = vmatprep.subr.bf16.mxu1 %v6106_v21  ;;  %v5690_v21 = vld [vmem:[%s5935_s7 + $0x148] sm:$0xff]  }
 0x361   :  { %3727 = vmatprep.subr.bf16.mxu0 %v5460_v0 }
 0x363   :  { %2079 = vmatpush1.bf16.msra.mxu1 %v6107_v24  ;;  %v5696_v24 = vld [vmem:[%s5935_s7 + $0x1f0] sm:$0xff]  }
 0x364   :  { %3728 = vmatpush3.bf16.msra.mxu0 %v5468_v15  ;;  %3697 = vmatprep.subr.bf16.mxu1 %v5473_v18 }
 0x365   :  { %3729 = vmatprep.subr.bf16.mxu0 %v5479_v34 }
 0x366   :  { %2097 = vmatmul.mubr.bf16.vlgmr.msra.gmra.mrb[36].mxu1 %v5345_v22  ;;  %v5522_v22 = vld [vmem:[%s5935_s7 + $0x50] sm:$0xff]  }
 0x367   :  { %3698 = vmatpush3.bf16.msra.mxu1 %v5485_v32  ;;  %2763 = vmatprep.mubr.bf16.mxu1 %v2283_v60  ;;  %v5702_v60 = vld [vmem:[%s5935_s7 + $0x108] sm:$0xff]  }
 0x368   :  { %3730 = vmatpush3.bf16.msra.mxu0 %v5492_v38  ;;  %3699 = vmatprep.subr.bf16.mxu1 %v5497_v61 }
 0x369   :  { %3731 = vmatprep.subr.bf16.mxu0 %v5503_v26 }
 0x36b   :  { %3700 = vmatpush3.bf16.msra.mxu1 %v5510_v43 }
 0x36c   :  { %3732 = vmatpush3.bf16.msra.mxu0 %v5517_v29  ;;  %3701 = vmatprep.subr.bf16.mxu1 %v5522_v22 }
 0x36d   :  { %3733 = vmatprep.subr.bf16.mxu0 %v5528_v17 }
 0x36f   :  { %3702 = vmatpush3.bf16.msra.mxu1 %v5534_v2 }
 0x370   :  { %3734 = vmatpush3.bf16.msra.mxu0 %v5541_v27  ;;  %3703 = vmatprep.subr.bf16.mxu1 %v5546_v35 }
 0x371   :  { %3763 = vmatprep.subr.bf16.mxu0 %v5552_v51 }
 0x373   :  { %3704 = vmatpush3.bf16.msra.mxu1 %v5558_v47  ;;  %2804 = vmatmul.mubr.bf16.vlgmr.msra.gmra.mrb[44].mxu0 %v2284_v7  ;;  %v5720_v7 = vld [vmem:[%s5935_s7 + $0x1f8] sm:$0xff]  }
 0x374   :  { %3764 = vmatpush3.bf16.msra.mxu0 %v5565_v3  ;;  %2883 = vmatprep.mubr.bf16.mxu0 %v2289_v31  ;;  %6108 = vst [vmem:[#allocation19_spill] sm:$0xff] %v5720_v7  ;;  %v5726_v31 = vld [vmem:[%s5935_s7 + $0x110] sm:$0xff]  }
 0x375   :  { %3705 = vmatprep.subr.bf16.mxu1 %v5571_v13  ;;  %3765 = vmatprep.subr.bf16.mxu0 %v5576_v41 }
 0x377   :  { %3706 = vmatpush3.bf16.msra.mxu1 %v5582_v39 }
 0x378   :  { %3766 = vmatpush3.bf16.msra.mxu0 %v5588_v40  ;;  %3707 = vmatprep.subr.bf16.mxu1 %v5593_v49 }
 0x379   :  { %3767 = vmatprep.subr.bf16.mxu0 %v5600_v52 }
 0x37b   :  { %3708 = vmatpush3.bf16.msra.mxu1 %v5606_v53 }
 0x37c   :  { %3768 = vmatpush3.bf16.msra.mxu0 %v5613_v57  ;;  %3709 = vmatprep.subr.bf16.mxu1 %v5618_v62 }
 0x37d   :  { %3769 = vmatprep.subr.bf16.mxu0 %v5624_v63 }
 0x37f   :  { %3710 = vmatpush3.bf16.msra.mxu1 %v5630_v5 }
 0x380   :  { %3770 = vmatpush3.bf16.msra.mxu0 %v5637_v6  ;;  %3711 = vmatprep.subr.bf16.mxu1 %v5642_v10 }
 0x381   :  { %3771 = vmatprep.subr.bf16.mxu0 %v5648_v11 }
 0x383   :  { %3712 = vmatpush3.bf16.msra.mxu1 %v5654_v16 }
 0x384   :  { %3772 = vmatpush3.bf16.msra.mxu0 %v5661_v23  ;;  %3741 = vmatprep.subr.bf16.mxu1 %v5666_v28 }
 0x385   :  { %3773 = vmatprep.subr.bf16.mxu0 %v5672_v44 }
 0x386   :  { %2764 = vmatmul.mubr.bf16.vlgmr.msra.gmra.mrb[40].mxu1 %v2282_v42  ;;  %v2280_v42 = vld [vmem:[#allocation2 + $0x30] sm:$0x3f] }
 0x387   :  { %3742 = vmatpush3.bf16.msra.mxu1 %v5678_v36  ;;  %2843 = vmatprep.mubr.bf16.mxu1 %v2287_v56  ;;  %v5745_v56 = vld [vmem:[%s5935_s7 + $0x118] sm:$0xff]   ;;  %v2288_v45 = vpack.c.bf16 %v2280_v42, %v2280_v42  ;;  %v5785_v42 = vld [vmem:[%s5935_s7 + $0x130] sm:$0xff]  }
 0x388   :  { %3774 = vmatpush3.bf16.msra.mxu0 %v5685_v48  ;;  %3743 = vmatprep.subr.bf16.mxu1 %v5690_v21 }
 0x389   :  { %3775 = vmatprep.subr.bf16.mxu0 %v5696_v24 }
 0x38b   :  { %3744 = vmatpush3.bf16.msra.mxu1 %v5702_v60 }
 0x38c   :  { %3776 = vmatpush3.bf16.msra.mxu0 %v5709_v46  ;;  %3745 = vmatprep.subr.bf16.mxu1 %v5714_v50 }
 0x38d   :  { %3777 = vmatprep.subr.bf16.mxu0 %v5720_v7 }
 0x38f   :  { %3746 = vmatpush3.bf16.msra.mxu1 %v5726_v31 }
 0x390   :  { %3778 = vmatpush3.bf16.msra.mxu0 %v5733_v4  ;;  %3747 = vmatprep.subr.bf16.mxu1 %v5738_v20  ;;  %v5791_v4 = vld [vmem:[%s5935_s7 + $0x178] sm:$0xff]  }
 0x391   :  { %3803 = vmatprep.subr.bf16.mxu0 %v5403_v1  ;;  %v5771_v1 = vld [vmem:[%s5935_s7 + $0x128] sm:$0xff]  }
 0x393   :  { %3748 = vmatpush3.bf16.msra.mxu1 %v5745_v56  ;;  %2884 = vmatmul.mubr.bf16.vlgmr.msra.gmra.mrb[48].mxu0 %v2288_v45  ;;  %v5777_v45 = vld [vmem:[%s5935_s7 + $0x170] sm:$0xff]  }
 0x394   :  { %3749 = vmatprep.subr.bf16.mxu1 %v5752_v37 }
 0x397   :  { %3750 = vmatpush3.bf16.msra.mxu1 %v5759_v58 }
 0x398   :  { %3751 = vmatprep.subr.bf16.mxu1 %v5765_v55 }
 0x399   :  { %3804 = vmatpush3.bf16.xpose.msra.mxu0 %v5411_v12  ;;  %v5797_v12 = vld [vmem:[%s5935_s7 + $0x138] sm:$0xff]  }
 0x39a   :  { %3805 = vmatprep.subr.bf16.mxu0 %v5417_v19  ;;  %v2278_v19 = vld [vmem:[#allocation2 + $0x20] sm:$0x3f] }
 0x39b   :  { %3752 = vmatpush3.bf16.msra.mxu1 %v5771_v1  ;;  %v2286_v7 = vpack.c.bf16 %v2278_v19, %v2278_v19  ;;  %v6116_v19 = vld [vmem:[#allocation62_spill] sm:$0xff] }
 0x39c   :  { %3753 = vmatprep.subr.bf16.mxu1 %v5777_v45 }
 0x39f   :  { %3754 = vmatpush3.bf16.msra.mxu1 %v5785_v42 }
 0x3a0   :  { %3755 = vmatprep.subr.bf16.mxu1 %v5791_v4 }
 0x3a1   :  { %3806 = vmatpush3.bf16.xpose.msra.mxu0 %v5425_v25 }
 0x3a2   :  { %3807 = vmatprep.subr.bf16.mxu0 %v5432_v54 }
 0x3a3   :  { %3756 = vmatpush3.bf16.msra.mxu1 %v5797_v12 }
 0x3a4   :  { %3785 = vmatprep.subr.bf16.mxu1 %v5473_v18 }
 0x3a6   :  { %2844 = vmatmul.mubr.bf16.vlgmr.msra.gmra.mrb[44].mxu1 %v2286_v7 }
 0x3a9   :  { %3808 = vmatpush3.bf16.xpose.msra.mxu0 %v5440_v30 }
 0x3aa   :  { %3809 = vmatprep.subr.bf16.mxu0 %v5446_v59 }
 0x3ac   :  { %3786 = vmatpush3.bf16.xpose.msra.mxu1 %v5485_v32 }
 0x3ad   :  { %3787 = vmatprep.subr.bf16.mxu1 %v5497_v61 }
 0x3b1   :  { %3810 = vmatpush3.bf16.xpose.msra.mxu0 %v5454_v9 }
 0x3b2   :  { %3811 = vmatprep.subr.bf16.mxu0 %v5460_v0  ;;  %v6110_v0 = vld [vmem:[#allocation58_spill] sm:$0xff] }
 0x3b4   :  { %3788 = vmatpush3.bf16.xpose.msra.mxu1 %v5510_v43 }
 0x3b5   :  { %3789 = vmatprep.subr.bf16.mxu1 %v5522_v22 }
 0x3b9   :  { %3812 = vmatpush3.bf16.xpose.msra.mxu0 %v5468_v15 }
 0x3ba   :  { %3813 = vmatprep.subr.bf16.mxu0 %v5479_v34  ;;  %v6111_v34 = vld [vmem:[#allocation59_spill] sm:$0xff] }
 0x3bc   :  { %3790 = vmatpush3.bf16.xpose.msra.mxu1 %v5534_v2 }
 0x3bd   :  { %3791 = vmatprep.subr.bf16.mxu1 %v5546_v35 }
 0x3c1   :  { %3814 = vmatpush3.bf16.xpose.msra.mxu0 %v5492_v38 }
 0x3c2   :  { %3815 = vmatprep.subr.bf16.mxu0 %v5503_v26 }
 0x3c4   :  { %3792 = vmatpush3.bf16.xpose.msra.mxu1 %v5558_v47 }
 0x3c5   :  { %3793 = vmatprep.subr.bf16.mxu1 %v5571_v13 }
 0x3c9   :  { %3816 = vmatpush3.bf16.xpose.msra.mxu0 %v5517_v29  ;;  %v6112_v29 = vld [vmem:[#allocation8_spill] sm:$0xff] }
 0x3ca   :  { %3817 = vmatprep.subr.bf16.mxu0 %v5528_v17  ;;  %v6113_v17 = vld [vmem:[#allocation10_spill] sm:$0xff] }
 0x3cc   :  { %3794 = vmatpush3.bf16.xpose.msra.mxu1 %v5582_v39 }
 0x3cd   :  { %3795 = vmatprep.subr.bf16.mxu1 %v5593_v49  ;;  %v6114_v49 = vld [vmem:[#allocation60_spill] sm:$0xff] }
 0x3d1   :  { %3818 = vmatpush3.bf16.xpose.msra.mxu0 %v5541_v27 }
 0x3d2   :  { %3839 = vmatprep.subr.bf16.mxu0 %v5552_v51 }
 0x3d4   :  { %3796 = vmatpush3.bf16.xpose.msra.mxu1 %v5606_v53 }
 0x3d5   :  { %3797 = vmatprep.subr.bf16.mxu1 %v5618_v62 }
 0x3dc   :  { %3798 = vmatpush3.bf16.xpose.msra.mxu1 %v5630_v5  ;;  %v6115_v5 = vld [vmem:[#allocation61_spill] sm:$0xff] }
 0x3dd   :  { %3799 = vmatprep.subr.bf16.mxu1 %v5642_v10 }
 0x3e4   :  { %3800 = vmatpush3.bf16.xpose.msra.mxu1 %v5654_v16 }
 0x3e5   :  { %3821 = vmatprep.subr.bf16.mxu1 %v5666_v28 }
 0x3f9   :  { %v5832_v25 = vpop.f32.mrb[28].mxu1 }
 0x3fa   :  { %v3906_v54 = vpop.f32.mrb[29].mxu1 }
 0x3fb   :  { %v1890_v30 = vpop.f32.mrb[30].mxu1 }
 0x3fc   :  { %v3907_v59 = vpop.f32.mrb[31].mxu1 }
 0x3fd   :  { %v6117_v59 = vld [vmem:[#allocation63_spill] sm:$0xff] }
 0x3fe   :  { %v1975_v9 = vpop.f32.mrb[32].mxu0 }
 0x3ff   :  { %v1976_v15 = vadd.f32 %v1975_v9, %v6110_v0  ;;  %v1977_v18 = vpop.f32.mrb[33].mxu0 }
 0x400   :  { %v1978_v32 = vadd.f32 %v1977_v18, %v6111_v34  ;;  %v1979_v38 = vpop.f32.mrb[34].mxu0 }
 0x401   :  { %4105 = vtanh.f32 %v1976_v15  ;;  %v1980_v61 = vpop.f32.mrb[35].mxu0  ;;  %v6118_v38 = vld [vmem:[#allocation9_spill] sm:$0xff] }
 0x402   :  { %4107 = vtanh.f32 %v1978_v32 }
 0x40b   :  { %v4106_v26 = vpop.eup %4105 }
 0x40c   :  { %v4108_v43 = vpop.eup %4107  ;;  %v3189_v22 = vsub.f32 %v4106_v26, %v6112_v29 }
 0x40d   :  { %v3190_v2 = vsub.f32 %v4108_v43, %v6113_v17  ;;  %v6119_v43 = vld [vmem:[#allocation11_spill] sm:$0xff] }
 0x40e   :  { %v3197_v27 = vmul.f32 %v3189_v22, %v3189_v22 }
 0x40f   :  { %v3198_v35 = vmul.f32 %v3190_v2, %v3190_v2 }
 0x410   :  { %v3206_v51 = vsel %vm3205_vm8, %v3197_v27, 0.0 }
 0x411   :  { %v3207_v47 = vsel %vm3205_vm8, %v3198_v35, 0.0 }
 0x412   :  { %v3208_v13 = vadd.f32 %v3207_v47, %v3206_v51 }
 0x419   :  { %v2016_v39 = vpop.f32.mrb[32].mxu1 }
 0x41a   :  { %v2017_v53 = vadd.f32 %v2016_v39, %v6114_v49  ;;  %v2018_v62 = vpop.f32.mrb[33].mxu1 }
 0x41b   :  { %v2019_v10 = vadd.f32 %v2018_v62, %v6115_v5  ;;  %v2020_v16 = vpop.f32.mrb[34].mxu1  ;;  %v6120_v62 = vld [vmem:[#allocation12_spill] sm:$0xff] }
 0x41c   :  { %4109 = vtanh.f32 %v2017_v53  ;;  %v2021_v28 = vpop.f32.mrb[35].mxu1 }
 0x41d   :  { %4111 = vtanh.f32 %v2019_v10 }
 0x41e   :  { %v2057_v7 = vpop.f32.mrb[36].mxu0 }
 0x41f   :  { %v2058_v54 = vadd.f32 %v2057_v7, %v6116_v19  ;;  %v2059_v30 = vpop.f32.mrb[37].mxu0 }
 0x420   :  { %v2060_v9 = vadd.f32 %v2059_v30, %v6117_v59  ;;  %v2061_v0 = vpop.f32.mrb[38].mxu0 }
 0x421   :  { %4113 = vtanh.f32 %v2058_v54  ;;  %v2062_v15 = vpop.f32.mrb[39].mxu0 }
 0x422   :  { %4115 = vtanh.f32 %v2060_v9 }
 0x426   :  { %v4110_v18 = vpop.eup %4109  ;;  %v2341_v34 = vpop.f32.mrb[40].mxu0 }
 0x427   :  { %v4112_v32 = vpop.eup %4111  ;;  %v3191_v61 = vsub.f32 %v4110_v18, %v6118_v38  ;;  %v3922_v26 = vpop.f32.mrb[41].mxu0 }
 0x428   :  { %v3192_v29 = vsub.f32 %v4112_v32, %v6119_v43  ;;  %v2344_v22 = vpop.f32.mrb[42].mxu0  ;;  %v6121_v26 = vld [vmem:[#allocation13_spill] sm:$0xff] }
 0x429   :  { %v3199_v17 = vmul.f32 %v3191_v61, %v3191_v61  ;;  %v3923_v2 = vpop.f32.mrb[43].mxu0 }
 0x42a   :  { %v3200_v27 = vmul.f32 %v3192_v29, %v3192_v29 }
 0x42b   :  { %v4114_v35 = vpop.eup %4113  ;;  %v3209_v51 = vsel %vm3205_vm8, %v3199_v17, 0.0  ;;  %v6122_v17 = vld [vmem:[#allocation14_spill] sm:$0xff] }
 0x42c   :  { %v4116_v47 = vpop.eup %4115  ;;  %v3193_v39 = vsub.f32 %v4114_v35, %v4477_v14  ;;  %v3210_v49 = vadd.f32 %v3209_v51, %v3208_v13  ;;  %v3211_v53 = vsel %vm3205_vm8, %v3200_v27, 0.0 }
 0x42d   :  { %v3194_v5 = vsub.f32 %v4116_v47, %v6120_v62 }
 0x42e   :  { %v3201_v10 = vmul.f32 %v3193_v39, %v3193_v39  ;;  %v3212_v16 = vadd.f32 %v3211_v53, %v3210_v49 }
 0x42f   :  { %v3202_v28 = vmul.f32 %v3194_v5, %v3194_v5 }
 0x430   :  { %v3213_v7 = vsel %vm3205_vm8, %v3201_v10, 0.0 }
 0x431   :  { %v3214_v19 = vadd.f32 %v3213_v7, %v3212_v16  ;;  %v3215_v54 = vsel %vm3205_vm8, %v3202_v28, 0.0 }
 0x433   :  { %v3216_v30 = vadd.f32 %v3215_v54, %v3214_v19 }
 0x439   :  { %v2098_v59 = vpop.f32.mrb[36].mxu1 }
 0x43a   :  { %v2099_v9 = vadd.f32 %v2098_v59, %v5254_v33  ;;  %v2100_v0 = vpop.f32.mrb[37].mxu1 }
 0x43b   :  { %v2101_v14 = vadd.f32 %v2100_v0, %v5257_v8  ;;  %v2102_v13 = vpop.f32.mrb[38].mxu1 }
 0x43c   :  { %4117 = vtanh.f32 %v2099_v9  ;;  %v2103_v15 = vpop.f32.mrb[39].mxu1 }
 0x43d   :  { %4119 = vtanh.f32 %v2101_v14 }
 0x446   :  { %v4118_v18 = vpop.eup %4117  ;;  %v3735_v32 = vpop.f32.mrb[44].mxu0 }
 0x447   :  { %v4120_v38 = vpop.eup %4119  ;;  %v3736_v61 = vpop.f32.mrb[45].mxu0  ;;  %v3195_v43 = vsub.f32 %v4118_v18, %v6121_v26 }
 0x448   :  { %v3737_v29 = vadd.f32 %v3736_v61, %v3735_v32  ;;  %v3738_v22 = vpop.f32.mrb[46].mxu0  ;;  %v3196_v2 = vsub.f32 %v4120_v38, %v6122_v17  ;;  %v388_v32 = vld [vmem:[%s5930_s2 + $0x4] ss:$0 sm:$0xff] }
 0x449   :  { %v3739_v27 = vpop.f32.mrb[47].mxu0  ;;  %v3203_v35 = vmul.f32 %v3195_v43, %v3195_v43  ;;  %v4208_v43 = vmov 0.2  }
 0x44a   :  { %v3204_v33 = vmul.f32 %v3196_v2, %v3196_v2 }
 0x44b   :  { %v3217_v51 = vsel %vm3205_vm8, %v3203_v35, 0.0 }
 0x44c   :  { %v3218_v8 = vadd.f32 %v3217_v51, %v3216_v30  ;;  %v3219_v47 = vsel %vm3205_vm8, %v3204_v33, 0.0 }
 0x44e   :  { %v5858_v39 = vadd.f32 %v3219_v47, %v3218_v8 }
 0x459   :  { %v3713_v49 = vpop.f32.mrb[40].mxu1 }
 0x45a   :  { %v3714_v53 = vpop.f32.mrb[41].mxu1 }
 0x45b   :  { %v3715_v62 = vadd.f32 %v3714_v53, %v3713_v49  ;;  %v3716_v5 = vpop.f32.mrb[42].mxu1 }
 0x45c   :  { %v3717_v10 = vpop.f32.mrb[43].mxu1 }
 0x45d   :  { %v2766_v16 = vadd.f32 %v3715_v62, %v2341_v34  ;;  %v389_v34 = vld [vmem:[%s5930_s2 + $0x5] ss:$0 sm:$0xff] }
 0x45f   :  { %v2806_v28 = vadd.f32 %v3737_v29, %v2766_v16 }
 0x466   :  { %v3779_v7 = vpop.f32.mrb[48].mxu0 }
 0x467   :  { %v3780_v19 = vpop.f32.mrb[49].mxu0 }
 0x468   :  { %v3781_v54 = vadd.f32 %v3780_v19, %v3779_v7  ;;  %v3782_v59 = vpop.f32.mrb[50].mxu0 }
 0x469   :  { %v3783_v9 = vpop.f32.mrb[51].mxu0 }
 0x479   :  { %v3757_v0 = vpop.f32.mrb[44].mxu1 }
 0x47a   :  { %v3758_v14 = vpop.f32.mrb[45].mxu1 }
 0x47b   :  { %v3759_v13 = vadd.f32 %v3758_v14, %v3757_v0  ;;  %v3760_v30 = vpop.f32.mrb[46].mxu1 }
 0x47c   :  { %v3761_v15 = vpop.f32.mrb[47].mxu1 }
 0x47d   :  { %v2846_v18 = vadd.f32 %v3759_v13, %v2806_v28 }
 0x47f   :  { %v2886_v38 = vadd.f32 %v3781_v54, %v2846_v18 }
 0x481   :  { %v2891_v61 = vadd.f32 %v2886_v38, %v388_v32  ;;  %v6128_v32 = vld [vmem:[#allocation7_spill] sm:$0xff] }
 0x482   :  { %vm2895_vm12 = vcmp.lt.s32.totalorder %v6128_v32, 4  ;;  %vm2894_vm13 = vcmp.lt.s32.totalorder %v6128_v32, 2  ;;  %vm2898_vm0 = vcmp.ge.s32.totalorder %v6128_v32, 4 }
 0x483   :  { %vm2900_vm9 = vcmp.gt.f32.partialorder %v2891_v61, 0.0  ;;  %v2901_v26 = vmul.f32 0.2, %v2891_v61 }
 0x484   :  { %v2928_v29 = vsel %vm2900_vm9, 1.0, %v4208_v43 }
 0x485   :  { %v2929_v22 = vmul.f32 %v2928_v29, %v389_v34  ;;  %v2902_v17 = vsel %vm2900_vm9, %v2891_v61, %v2901_v26 }
 0x486   :  { %v2903_v2 = vmul.f32 %v2902_v17, %v389_v34  ;;  %v4189_v34 = vld [vmem:[%s5930_s2 + $0x1] ss:$0 sm:$0xff] }
 0x487   :  { %v2930_v27 = vpack.c.bf16 %v2929_v22, %v2929_v22 }
 0x488   :  { %v2905_v35 = vsel %vm2904_vm10, %v2903_v2, 0.0 }
 0x489   :  { %3801 = vmatprep.mubr.bf16.mxu1 %v2930_v27  ;;  %3819 = vmatprep.mubr.bf16.mxu0 %v2930_v27 }
 0x48a   :  { %2906 = vadd.xlane.f32.xlu0 %v2905_v35  ;;  %3802 = vmatmul.mubr.bf16.vlgmr.msra.gmra.mrb[48].mxu1 %v2930_v27 }
 0x48b   :  { %3820 = vmatmul.mubr.bf16.vlgmr.msra.gmra.mrb[52].mxu0 %v2930_v27  ;;  %3822 = vmatpush3.bf16.xpose.msra.mxu1 %v5678_v36 }
 0x48c   :  { %3840 = vmatpush3.bf16.xpose.msra.mxu0 %v5565_v3  ;;  %3837 = vmatprep.mubr.bf16.mxu1 %v2930_v27  ;;  %v6126_v3 = vld [vmem:[#allocation17_spill] sm:$0xff] }
 0x48d   :  { %3855 = vmatprep.mubr.bf16.mxu0 %v2930_v27  ;;  %3823 = vmatprep.subr.bf16.mxu1 %v5690_v21 }
 0x48e   :  { %3841 = vmatprep.subr.bf16.mxu0 %v5576_v41  ;;  %v6127_v41 = vld [vmem:[#allocation16_spill] sm:$0xff] }
 0x493   :  { %3824 = vmatpush3.bf16.xpose.msra.mxu1 %v5702_v60 }
 0x494   :  { %3842 = vmatpush3.bf16.xpose.msra.mxu0 %v5588_v40  ;;  %3825 = vmatprep.subr.bf16.mxu1 %v5714_v50 }
 0x495   :  { %3843 = vmatprep.subr.bf16.mxu0 %v5600_v52 }
 0x49b   :  { %3826 = vmatpush3.bf16.xpose.msra.mxu1 %v5726_v31 }
 0x49c   :  { %3844 = vmatpush3.bf16.xpose.msra.mxu0 %v5613_v57  ;;  %3827 = vmatprep.subr.bf16.mxu1 %v5738_v20 }
 0x49d   :  { %3845 = vmatprep.subr.bf16.mxu0 %v5624_v63 }
 0x4a3   :  { %3828 = vmatpush3.bf16.xpose.msra.mxu1 %v5745_v56 }
 0x4a4   :  { %3846 = vmatpush3.bf16.xpose.msra.mxu0 %v5637_v6  ;;  %3829 = vmatprep.subr.bf16.mxu1 %v5752_v37  ;;  %v6123_v37 = vld [vmem:[#allocation19_spill] sm:$0xff] }
 0x4a5   :  { %3847 = vmatprep.subr.bf16.mxu0 %v5648_v11 }
 0x4ab   :  { %3830 = vmatpush3.bf16.xpose.msra.mxu1 %v5759_v58  ;;  %v6125_v58 = vmov 0.0  }
 0x4ac   :  { %3848 = vmatpush3.bf16.xpose.msra.mxu0 %v5661_v23  ;;  %3831 = vmatprep.subr.bf16.mxu1 %v5765_v55  ;;  %v6124_v55 = vld [vmem:[#allocation18_spill] sm:$0xff]  ;;  %v2896_v61 = vsel %vm2895_vm12, -1.0, %v6125_v58 }
 0x4ad   :  { %3849 = vmatprep.subr.bf16.mxu0 %v5672_v44  ;;  %v2897_v43 = vsel %vm2894_vm13, 1.0, %v2896_v61 }
 0x4b3   :  { %3832 = vmatpush3.bf16.xpose.msra.mxu1 %v5771_v1 }
 0x4b4   :  { %3850 = vmatpush3.bf16.xpose.msra.mxu0 %v5685_v48  ;;  %3833 = vmatprep.subr.bf16.mxu1 %v5777_v45 }
 0x4b5   :  { %3851 = vmatprep.subr.bf16.mxu0 %v5696_v24 }
 0x4bb   :  { %3834 = vmatpush3.bf16.xpose.msra.mxu1 %v5785_v42 }
 0x4bc   :  { %3852 = vmatpush3.bf16.xpose.msra.mxu0 %v5709_v46  ;;  %3835 = vmatprep.subr.bf16.mxu1 %v5791_v4 }
 0x4bd   :  { %3853 = vmatprep.subr.bf16.mxu0 %v6123_v37 }
 0x4c3   :  { %3836 = vmatpush3.bf16.xpose.msra.mxu1 %v5797_v12 }
 0x4c4   :  { %3854 = vmatpush3.bf16.xpose.msra.mxu0 %v6124_v55  ;;  %3924 = vmatprep.subr.bf16.mxu1 %v6125_v58 }
 0x4ca   :  { %3838 = vmatmul.mubr.bf16.vlgmr.msra.gmra.mrb[52].mxu1 %v2930_v27 }
 0x4cb   :  { %3856 = vmatmul.mubr.bf16.vlgmr.msra.gmra.mrb[56].mxu0 %v2930_v27  ;;  %3925 = vmatpush3.bf16.xpose.msra.mxu1 %v6126_v3 }
 0x4cc   :  { %3926 = vmatprep.subr.bf16.mxu1 %v6125_v58  ;;  %3928 = vmatprep.mubr.msk.bf16.mxu1 %vm4206_vm1, %v6125_v58 }
 0x4d3   :  { %3927 = vmatpush3.bf16.xpose.msra.mxu1 %v6127_v41  ;;  %v1888_v41 = vadd.f32 %v4189_v34, %v5832_v25 }
 0x4da   :  { %3929 = vmatmul.mubr.bf16.vlgmr.msra.gmra.mrb[56].mxu1 %v2930_v27 }
 0x517   :  { %v2907_v38 = vpop.xlane.xlu0 %2906 }
 0x518   :  { %v2908_v26 = vadd.f32 %v4189_v34, %v2907_v38 }
 0x51a   :  { %v2909_v29 = vmul.f32 %v2908_v26, %v2897_v43 }
 0x55d   :  { %v2965_v40 = vpop.f32.mrb[48].mxu1 }
 0x55e   :  { %v3135_v52 = vmul.f32 %v2965_v40, %v2965_v40  ;;  %v3006_v57 = vpop.f32.mrb[52].mxu0  ;;  %v2967_v63 = vpop.f32.mrb[49].mxu1 }
 0x55f   :  { %v3137_v6 = vmul.f32 %v3006_v57, %v3006_v57  ;;  %v3136_v11 = vmul.f32 %v2967_v63, %v2967_v63  ;;  %v3008_v23 = vpop.f32.mrb[53].mxu0  ;;  %v2969_v44 = vpop.f32.mrb[50].mxu1  ;;  %v2899_v63 = vsel %vm2898_vm0, 1.0, %v6125_v58 }
 0x560   :  { %v3143_v36 = vsel %vm2904_vm10, %v3135_v52, 0.0  ;;  %v3010_v48 = vpop.f32.mrb[54].mxu0  ;;  %v2970_v21 = vpop.f32.mrb[51].mxu1  ;;  %v3138_v60 = vmul.f32 %v3008_v23, %v3008_v23 }
 0x561   :  { %v3144_v24 = vsel %vm2904_vm10, %v3136_v11, 0.0  ;;  %v3011_v46 = vpop.f32.mrb[55].mxu0  ;;  %v3146_v31 = vsel %vm2904_vm10, %v3137_v6, 0.0  ;;  %v6129_v6 = vld [vmem:[#allocation15_spill] sm:$0xff] }
 0x562   :  { %v3145_v50 = vadd.f32 %v3144_v24, %v3143_v36  ;;  %v3148_v20 = vsel %vm2904_vm10, %v3138_v60, 0.0  ;;  %v3233_v11 = vsub.f32 %v1888_v41, %v6129_v6 }
 0x564   :  { %v3147_v4 = vadd.f32 %v3146_v31, %v3145_v50  ;;  %v3234_v36 = vmul.f32 %v3233_v11, %v3233_v11 }
 0x566   :  { %v3149_v56 = vadd.f32 %v3148_v20, %v3147_v4  ;;  %v3235_v48 = vsel %vm2269_vm4, %v3234_v36, 0.0 }
 0x59d   :  { %v3047_v1 = vpop.f32.mrb[52].mxu1 }
 0x59e   :  { %v3139_v45 = vmul.f32 %v3047_v1, %v3047_v1  ;;  %v3088_v42 = vpop.f32.mrb[56].mxu0  ;;  %v3049_v12 = vpop.f32.mrb[53].mxu1 }
 0x59f   :  { %v3140_v33 = vmul.f32 %v3049_v12, %v3049_v12  ;;  %v3090_v51 = vpop.f32.mrb[57].mxu0  ;;  %v3051_v8 = vpop.f32.mrb[54].mxu1  ;;  %v3141_v49 = vmul.f32 %v3088_v42, %v3088_v42 }
 0x5a0   :  { %v3150_v47 = vsel %vm2904_vm10, %v3139_v45, 0.0  ;;  %v3092_v53 = vpop.f32.mrb[58].mxu0  ;;  %v3052_v62 = vpop.f32.mrb[55].mxu1  ;;  %v3142_v28 = vmul.f32 %v3090_v51, %v3090_v51 }
 0x5a1   :  { %v3151_v5 = vadd.f32 %v3150_v47, %v3149_v56  ;;  %v3152_v10 = vsel %vm2904_vm10, %v3140_v33, 0.0  ;;  %v3093_v16 = vpop.f32.mrb[59].mxu0  ;;  %v3154_v19 = vsel %vm2904_vm10, %v3141_v49, 0.0 }
 0x5a2   :  { %v3156_v59 = vsel %vm2904_vm10, %v3142_v28, 0.0 }
 0x5a3   :  { %v3153_v7 = vadd.f32 %v3152_v10, %v3151_v5 }
 0x5a5   :  { %v3155_v54 = vadd.f32 %v3154_v19, %v3153_v7 }
 0x5a7   :  { %v3157_v9 = vadd.f32 %v3156_v59, %v3155_v54 }
 0x5a9   :  { %3158 = vadd.xlane.f32.xlu0 %v3157_v9 }
 0x5ad   :  { %v3129_v0 = vpop.f32.mrb[56].mxu1 }
 0x5ae   :  { %v3160_v14 = vmul.f32 %v3129_v0, %v3129_v0  ;;  %v3930_v13 = vpop.f32.mrb[57].mxu1 }
 0x5af   :  { %v3132_v30 = vpop.f32.mrb[58].mxu1 }
 0x5b0   :  { %v3931_v15 = vpop.f32.mrb[59].mxu1  ;;  %v3162_v18 = vsel %vm3161_vm11, %v3160_v14, 0.0 }
 0x5b1   :  { %3163 = vadd.xlane.f32.xlu1 %v3162_v18 }
 0x5c2   :  { %2911 = vrot.lane.b32.xlu1 %v2909_v29, %s4209_s27 }
 0x636   :  { %v3159_v22 = vpop.xlane.xlu0 %3158 }
 0x63e   :  { %v3164_v17 = vpop.xlane.xlu1 %3163 }
 0x63f   :  { %v3165_v2 = vadd.f32 %v3164_v17, %v3159_v22 }
 0x641   :  { %4121 = vrsqrt.f32 %v3165_v2  ;;  %vm3168_vm15 = vcmp.eq.f32.partialorder %v3165_v2, inf  ;;  %v3171_v3 = vand.u32 2147483648, %v3165_v2  ;;  %vm3170_vm1 = vcmp.eq.f32.partialorder %v3165_v2, 0.0 }
 0x642   :  { %v2912_v27 = vpop.permute.xlu1 %2911 }
 0x643   :  { %v2915_v35 = vsel %vm2914_vm14, %v2912_v27, 0.0 }
 0x644   :  { %2916 = vadd.xlane.f32.xlu0 %v2915_v35 }
 0x648   :  { %3221 = vadd.xlane.f32.xlu0 %v5858_v39 }
 0x64b   :  { %v4122_v37 = vpop.eup %4121 }
 0x64c   :  { %v3167_v55 = vmul.f32 %v4122_v37, %v3165_v2 }
 0x64e   :  { %v3169_v40 = vsel %vm3168_vm15, %v3165_v2, %v3167_v55 }
 0x64f   :  { %v3172_v52 = vsel %vm3170_vm1, %v3171_v3, %v3169_v40 }
 0x650   :  { %v3493_v57 = vadd.f32 -1.0, %v3172_v52 }
 0x652   :  { %v3174_v23 = vmul.f32 %v3493_v57, %v3493_v57 }
 0x654   :  { %v3175_v44 = vmul.f32 %v3174_v23, %v2899_v63 }
 0x656   :  { %v3176_v39 = vsel %vm2914_vm14, %v3175_v44, 0.0 }
 0x657   :  { %3177 = vadd.xlane.f32.xlu0 %v3176_v39 }
 0x65b   :  { %3236 = vadd.xlane.f32.xlu0 %v3235_v48 }
 0x6d1   :  { %v2917_v25 = vpop.xlane.xlu0 %2916 }
 0x6d2   :  { %v2918_v21 = vrot.slane %v2917_v25, 4 }
 0x6d4   :  { %v2919_v24 = vadd.f32 %v2918_v21, %v2917_v25 }
 0x6d5   :  { %v3222_v50 = vpop.xlane.xlu0 %3221 }
 0x6d6   :  { %v2920_v60 = vrot.slane %v2919_v24, 2  ;;  %v3223_v4 = vrot.slane %v3222_v50, 4 }
 0x6d8   :  { %v2921_v46 = vadd.f32 %v2920_v60, %v2919_v24  ;;  %v3224_v20 = vadd.f32 %v3223_v4, %v3222_v50 }
 0x6da   :  { %v2922_v31 = vrot.slane %v2921_v46, 1  ;;  %v3225_v56 = vrot.slane %v3224_v20, 2 }
 0x6dc   :  { %v2923_v58 = vadd.f32 %v2922_v31, %v2921_v46  ;;  %v3226_v33 = vadd.f32 %v3225_v56, %v3224_v20 }
 0x6de   :  { %3932 = vpush %v2923_v58  ;;  %v3227_v53 = vrot.slane %v3226_v33, 1 }
 0x6e0   :  { %v3228_v28 = vadd.f32 %v3227_v53, %v3226_v33 }
 0x6e4   :  { %v3178_v1 = vpop.xlane.xlu0 %3177 }
 0x6e5   :  { %v3179_v45 = vrot.slane %v3178_v1, 4 }
 0x6e7   :  { %v3180_v42 = vadd.f32 %v3179_v45, %v3178_v1 }
 0x6e8   :  { %v3237_v12 = vpop.xlane.xlu0 %3236 }
 0x6e9   :  { %v3181_v51 = vrot.slane %v3180_v42, 2  ;;  %v3238_v8 = vrot.slane %v3237_v12, 4 }
 0x6eb   :  { %v3239_v47 = vadd.f32 %v3238_v8, %v3237_v12  ;;  %v3182_v49 = vadd.f32 %v3181_v51, %v3180_v42 }
 0x6ed   :  { %v3240_v62 = vrot.slane %v3239_v47, 2  ;;  %v3183_v5 = vrot.slane %v3182_v49, 1 }
 0x6ef   :  { %v3241_v10 = vadd.f32 %v3240_v62, %v3239_v47  ;;  %v3184_v16 = vadd.f32 %v3183_v5, %v3182_v49 }
 0x6f1   :  { %3934 = vpush %v3184_v16  ;;  %v3242_v7 = vrot.slane %v3241_v10, 1 }
 0x6f2   :  { %3936 = vpush %v3228_v28 }
 0x6f3   :  { %v3243_v19 = vadd.f32 %v3242_v7, %v3241_v10 }
 0x6f5   :  { %3938 = vpush %v3243_v19 }
 0x70f   :  { %s3933_s2 = spop %3932 }
 0x710   :  { %s2927_s3 = smul.f32 0.5, %s3933_s2 }
 0x712   :  { %3258 = sst [smem:[#allocation4 + $0x1]] %s2927_s3 }
 0x713   :  { %s3248_s8 = ssub.f32 0.0, %s2927_s3 }
 0x722   :  { %s3935_s28 = spop %3934 }
 0x723   :  { %s3188_s5 = smul.f32 0.5, %s3935_s28  ;;  %s3937_s29 = spop %3936 }
 0x724   :  { %s3232_s0 = smul.f32 0.5, %s3937_s29 }
 0x725   :  { %s3249_s12 = smul.f32 10.0, %s3188_s5 }
 0x726   :  { %s3251_s13 = smul.f32 0.1, %s3232_s0  ;;  %3260 = sst [smem:[#allocation4 + $0x2]] %s3232_s0 }
 0x727   :  { %s3250_s14 = sadd.f32 %s3249_s12, %s3248_s8  ;;  %s3939_s15 = spop %3938 }
 0x728   :  { %s3252_s16 = sadd.f32 %s3251_s13, %s2927_s3  ;;  %s3247_s17 = smul.f32 0.5, %s3939_s15 }
 0x729   :  { %3256 = sst [smem:[#allocation4]] %s3250_s14 }
 0x72a   :  { %s3253_s18 = smul.f32 0.1, %s3247_s17  ;;  %3262 = sst [smem:[#allocation4 + $0x3]] %s3247_s17 }
 0x72c   :  { %s3254_s19 = sadd.f32 %s3253_s18, %s3252_s16 }
 0x72e   :  { %3264 = sst [smem:[#allocation4 + $0x4]] %s3254_s19 }
 0x72f   :  { %4201 = shalt.err (!%p4198_p4)
}
 0x730   :  { %s4210_s9 = smov [#allocation4]  }
 0x731   :  { %3274 = dma.smem_to_vmem %s4210_s9, 16, %s3272_s11, [#allocation5]  }
 0x732   :  { %4202 = dma.done.wait [#allocation5], 16  }
 0x733   :  { %4203 = vsyncadd [#allocation5], 4294967280 }
 0x734   :  { %3278 = sfence }
 0x735   :  { %3279 = vsyncpa [#allocation5], 1 }

</bundles_post_ra>
